<compile_context>
chip_gen: v6e
topology: v6e:2x2x1
jax: 0.10.0
libtpu: 0.0.40
codegen_flags: <defaults>
</compile_context>

<pallas_src>
import jax
import jax.numpy as jnp
from jax.experimental import pallas as pl
from jax.experimental.pallas import tpu as pltpu

IGNORE_INDEX = 255
ADL_CL_WEIGHT = 0.01
ADL_COM_WEIGHT = 0.01
_VMEM_LIMIT = 32 * 1024 * 1024  # explicit budget; keeps headroom on v7x (64 MiB)


def _round_up(x, m):
    return ((x + m - 1) // m) * m


# ----------------------------------------------------------------------------
# align_corners=True bilinear interpolation expressed as matrices:
# out[y, x] = sum_{i,j} Wy[y, i] * Wx[x, j] * in[i, j]
# ----------------------------------------------------------------------------
def _align_corners_weights(out_size, in_size, dtype=jnp.float32):
    if out_size == 1:
        coord = jnp.zeros((1,), jnp.float32)
    else:
        coord = jnp.arange(out_size, dtype=jnp.float32) * (
            (in_size - 1) / (out_size - 1)
        )
    lo = jnp.clip(jnp.floor(coord).astype(jnp.int32), 0, in_size - 1)
    hi = jnp.minimum(lo + 1, in_size - 1)
    frac = coord - lo.astype(jnp.float32)
    w = (
        jax.nn.one_hot(lo, in_size, dtype=dtype) * (1.0 - frac)[:, None]
        + jax.nn.one_hot(hi, in_size, dtype=dtype) * frac[:, None]
    )
    return w  # (out_size, in_size)


# ----------------------------------------------------------------------------
# Kernel 1: fused bilinear upsample + per-pixel masked cross entropy.
# Grid: (N, H // TH).  Outputs per-image (loss_sum, valid_count).
# ----------------------------------------------------------------------------
def _fused_interp_ce_kernel(seg_ref, wy_ref, wxt_ref, tgt_ref, out_ref,
                            tmp_ref, acc_loss_ref, acc_cnt_ref):
    num_classes = tmp_ref.shape[0]
    t = pl.program_id(1)

    @pl.when(t == 0)
    def _():
        # Per-image W-axis interpolation, cached in VMEM for all row tiles:
        # tmp[c] = seg[n, c] (Hs, Ws) @ WxT (Ws, W)  -> (Hs, W)
        seg = seg_ref[0].astype(jnp.float32)           # (C, Hs, Ws)
        wxt = wxt_ref[...]                             # (Ws, W)
        for c in range(num_classes):
            tmp_ref[c] = jnp.dot(seg[c], wxt, preferred_element_type=jnp.float32)
        acc_loss_ref[...] = jnp.zeros_like(acc_loss_ref)
        acc_cnt_ref[...] = jnp.zeros_like(acc_cnt_ref)

    # H-axis interpolation for this row tile: per-class (TH,Hs)@(Hs,W) matmuls.
    wy = wy_ref[...]                                   # (TH, Hs)
    tmp = tmp_ref[...]                                 # (C, Hs, W)
    preds = [jnp.dot(wy, tmp[c], preferred_element_type=jnp.float32)
             for c in range(num_classes)]              # C x (TH, W), lane-dense

    tgt = tgt_ref[0]                                   # (TH, W) int32

    # Class reduction is pure VPU over lane-dense (TH, W) tiles.
    m = preds[0]
    for p in preds[1:]:
        m = jnp.maximum(m, p)
    sum_exp = jnp.exp(preds[0] - m)
    for p in preds[1:]:
        sum_exp = sum_exp + jnp.exp(p - m)
    lse = jnp.log(sum_exp) + m

    picked = jnp.zeros_like(m)
    for c, p in enumerate(preds):
        picked = picked + jnp.where(tgt == c, p, 0.0)

    valid = tgt != IGNORE_INDEX
    acc_loss_ref[...] += jnp.where(valid, lse - picked, 0.0)
    acc_cnt_ref[...] += valid.astype(jnp.float32)

    @pl.when(t == pl.num_programs(1) - 1)
    def _():
        loss_sum = jnp.sum(acc_loss_ref[...])
        cnt = jnp.sum(acc_cnt_ref[...])
        row = jax.lax.broadcasted_iota(jnp.int32, out_ref.shape, 1)
        # row 0 of the (1, 8, 128) output block carries loss_sum, row 1 the count.
        out_ref[...] = jnp.where(row == 0, loss_sum, cnt)


def _pick_row_tile(H, W, C, budget_bytes=4 << 20):
    """Largest row tile (multiple of 8 dividing H, or H itself) within budget."""
    max_rows = max(8, budget_bytes // (max(C, 8) * max(W, 1) * 4))
    if H <= max_rows:
        return H
    th = H
    for cand in range(8, max_rows + 1, 8):
        if H % cand == 0:
            th = cand
    return th


def fused_upsample_ce_sums(seg, target):
    """Returns (N, 8, 128) f32: [:, 0, 0] = per-image CE loss sum, [:, 1, 0] = count."""
    N, C, Hs, Ws = seg.shape
    _, H, W = target.shape
    TH = _pick_row_tile(H, W, C)
    T = H // TH

    wy = _align_corners_weights(H, Hs)          # (H, Hs)
    wxt = _align_corners_weights(W, Ws).T       # (Ws, W)
    tgt = target.astype(jnp.int32)

    return pl.pallas_call(
        _fused_interp_ce_kernel,
        out_shape=jax.ShapeDtypeStruct((N, 8, 128), jnp.float32),
        grid_spec=pltpu.PrefetchScalarGridSpec(
            num_scalar_prefetch=0,
            grid=(N, T),
            in_specs=[
                pl.BlockSpec((1, C, Hs, Ws), lambda n, t: (n, 0, 0, 0)),
                pl.BlockSpec((TH, Hs), lambda n, t: (t, 0)),
                pl.BlockSpec((Ws, W), lambda n, t: (0, 0)),
                pl.BlockSpec((1, TH, W), lambda n, t: (n, t, 0)),
            ],
            out_specs=pl.BlockSpec((1, 8, 128), lambda n, t: (n, 0, 0)),
            scratch_shapes=[
                pltpu.VMEM((C, Hs, W), jnp.float32),   # W-interpolated seg
                pltpu.VMEM((TH, W), jnp.float32),      # loss accumulator
                pltpu.VMEM((TH, W), jnp.float32),      # valid-count accumulator
            ],
        ),
        compiler_params=pltpu.CompilerParams(
            dimension_semantics=("parallel", "arbitrary"),
            vmem_limit_bytes=_VMEM_LIMIT,
        ),
    )(seg, wy, wxt, tgt)


# ----------------------------------------------------------------------------
# Kernel 2: contrastive losses (ADLCL cross entropy + ADLCOM (1 - logit)^2),
# pixels on lanes (logits presented as (K, M)), accumulated in VMEM, SMEM
# epilogue write of (ce_sum, com_sum, count).
# ----------------------------------------------------------------------------
def _contrast_sums_kernel(logits_ref, tgt_ref, out_ref,
                          acc_ce_ref, acc_com_ref, acc_cnt_ref):
    i = pl.program_id(0)

    @pl.when(i == 0)
    def _():
        acc_ce_ref[...] = jnp.zeros_like(acc_ce_ref)
        acc_com_ref[...] = jnp.zeros_like(acc_com_ref)
        acc_cnt_ref[...] = jnp.zeros_like(acc_cnt_ref)

    logits = logits_ref[...].astype(jnp.float32)   # (K, TM) classes x pixels
    tgt = tgt_ref[...]                             # (1, TM) int32
    m = jnp.max(logits, axis=0, keepdims=True)
    lse = jnp.log(jnp.sum(jnp.exp(logits - m), axis=0, keepdims=True)) + m
    cls = jax.lax.broadcasted_iota(jnp.int32, logits.shape, 0)
    picked = jnp.sum(jnp.where(cls == tgt, logits, 0.0), axis=0, keepdims=True)
    valid = tgt != IGNORE_INDEX
    acc_ce_ref[...] += jnp.where(valid, lse - picked, 0.0)
    acc_com_ref[...] += jnp.where(valid, (1.0 - picked) ** 2, 0.0)
    acc_cnt_ref[...] += valid.astype(jnp.float32)

    @pl.when(i == pl.num_programs(0) - 1)
    def _():
        out_ref[0] = jnp.sum(acc_ce_ref[...])
        out_ref[1] = jnp.sum(acc_com_ref[...])
        out_ref[2] = jnp.sum(acc_cnt_ref[...])


def contrast_loss_sums(contrast_logits, contrast_target):
    M, K = contrast_logits.shape
    TM = min(4096, _round_up(max(M, 1), 128))
    Mpad = _round_up(max(M, 1), TM)

    # Lane-dense layout: classes on sublanes, pixels on lanes; pad tail pixels
    # with IGNORE_INDEX so the kernel's masking drops them.
    logits_t = jnp.pad(contrast_logits.T, ((0, 0), (0, Mpad - M)))
    tgt = jnp.pad(contrast_target.astype(jnp.int32), (0, Mpad - M),
                  constant_values=IGNORE_INDEX).reshape(1, Mpad)

    return pl.pallas_call(
        _contrast_sums_kernel,
        out_shape=jax.ShapeDtypeStruct((3,), jnp.float32),
        grid_spec=pltpu.PrefetchScalarGridSpec(
            num_scalar_prefetch=0,
            grid=(Mpad // TM,),
            in_specs=[
                pl.BlockSpec((K, TM), lambda i: (0, i)),
                pl.BlockSpec((1, TM), lambda i: (0, i)),
            ],
            out_specs=pl.BlockSpec(memory_space=pltpu.SMEM),
            scratch_shapes=[
                pltpu.VMEM((1, TM), jnp.float32),
                pltpu.VMEM((1, TM), jnp.float32),
                pltpu.VMEM((1, TM), jnp.float32),
            ],
        ),
        compiler_params=pltpu.CompilerParams(
            dimension_semantics=("arbitrary",),
            vmem_limit_bytes=_VMEM_LIMIT,
        ),
    )(logits_t, tgt)


# ----------------------------------------------------------------------------
# Full DistanceOptimizationLoss forward (dict-input branch)
# ----------------------------------------------------------------------------
@jax.jit
def distance_optimization_loss(seg, contrast_logits, contrast_target, target):
    # _scale_target(target, (H, W)) is the identity here: seg is upsampled to
    # the target's own spatial size before the CE.
    sums = fused_upsample_ce_sums(seg, target)                  # (N, 8, 128)
    rdl_ce = jnp.sum(sums[:, 0, 0]) / jnp.sum(sums[:, 1, 0])

    c_sums = contrast_loss_sums(contrast_logits, contrast_target)  # (3,)
    adl_cl = c_sums[0] / c_sums[2]
    adl_com = c_sums[1] / c_sums[2]
    # NOTE: like PyTorch, this yields NaN if every target is IGNORE_INDEX.
    return rdl_ce + ADL_CL_WEIGHT * adl_cl + ADL_COM_WEIGHT * adl_com


# ----------------------------------------------------------------------------
# Pure-JAX reference (for sanity checking against the Pallas kernels)
# ----------------------------------------------------------------------------
def _ref_masked_ce(logits, target):
    valid = target != IGNORE_INDEX
    lse = jax.nn.logsumexp(logits, axis=-1)
    safe_tgt = jnp.where(valid, target, 0)
    picked = jnp.take_along_axis(logits, safe_tgt[:, None], axis=-1)[:, 0]
    losses = jnp.where(valid, lse - picked, 0.0)
    return jnp.sum(losses) / jnp.sum(valid), picked, valid


def _ref_loss(seg, contrast_logits, contrast_target, target):
    N, C, Hs, Ws = seg.shape
    H, W = target.shape[1], target.shape[2]
    wy = _align_corners_weights(H, Hs)
    wx = _align_corners_weights(W, Ws)
    pred = jnp.einsum("hi,ncij,wj->nchw", wy, seg.astype(jnp.float32), wx)
    logits_2d = jnp.transpose(pred, (0, 2, 3, 1)).reshape(N * H * W, C)
    rdl_ce, _, _ = _ref_masked_ce(logits_2d, target.reshape(-1))
    adl_cl, picked, valid = _ref_masked_ce(
        contrast_logits.astype(jnp.float32), contrast_target
    )
    adl_com = jnp.sum(jnp.where(valid, (1.0 - picked) ** 2, 0.0)) / jnp.sum(valid)
    return rdl_ce + ADL_CL_WEIGHT * adl_cl + ADL_COM_WEIGHT * adl_com


if __name__ == "__main__":
    key = jax.random.PRNGKey(0)
    k_seg, k_tgt, k_clg, k_ctg, k_ign1, k_ign2 = jax.random.split(key, 6)

    N, C = 2, 8            # batch, num segmentation classes
    Hs = Ws = 8            # seg feature-map spatial size
    H = W = 16             # target (label) spatial size
    M, K = 256, 24         # contrastive pixels, prototype-logit classes

    seg = jax.random.normal(k_seg, (N, C, Hs, Ws), dtype=jnp.float32)
    target = jax.random.randint(k_tgt, (N, H, W), 0, C, dtype=jnp.int32)
    target = jnp.where(
        jax.random.uniform(k_ign1, (N, H, W)) < 0.2, IGNORE_INDEX, target
    )

    contrast_logits = jax.random.normal(k_clg, (M, K), dtype=jnp.float32)
    contrast_target = jax.random.randint(k_ctg, (M,), 0, K, dtype=jnp.int32)
    contrast_target = jnp.where(
        jax.random.uniform(k_ign2, (M,)) < 0.2, IGNORE_INDEX, contrast_target
    )

    loss = distance_optimization_loss(seg, contrast_logits, contrast_target, target)
    loss = jax.block_until_ready(loss)

    ref = _ref_loss(seg, contrast_logits, contrast_target, target)
    assert jnp.allclose(loss, ref, rtol=1e-4, atol=1e-4), (loss, ref)

    print("KERNEL_OK")
</pallas_src>

<mosaic_0001>
module attributes {stable_mosaic.version = 11 : i64} {
  func.func @_contrast_sums_kernel(%arg0: i32, %arg1: memref<24x256xf32, #tpu.memory_space<vmem>>, %arg2: memref<1x256xi32, #tpu.memory_space<vmem>>, %arg3: memref<3xf32, #tpu.memory_space<smem>>, %arg4: memref<1x256xf32, #tpu.memory_space<vmem>>, %arg5: memref<1x256xf32, #tpu.memory_space<vmem>>, %arg6: memref<1x256xf32, #tpu.memory_space<vmem>>) attributes {dimension_semantics = [#tpu.dimension_semantics<arbitrary>], iteration_bounds = array<i64: 1>, scalar_prefetch = 0 : i64, scratch_operands = 3 : i64, tpu.core_type = #tpu.core_type<tc>, window_params = [{transform_indices = @transform_0, window_bounds = array<i64: 24, 256>}, {transform_indices = @transform_1, window_bounds = array<i64: 1, 256>}, {transform_indices = @transform_2, window_bounds = array<i64: 3>}]} {
    %c0_i32 = arith.constant 0 : i32
    %0 = arith.cmpi eq, %arg0, %c0_i32 : i32
    %1 = arith.extui %0 : i1 to i32
    %c0_i32_0 = arith.constant 0 : i32
    %2 = arith.cmpi ne, %1, %c0_i32_0 : i32
    scf.if %2 {
      %cst_24 = arith.constant 0.000000e+00 : f32
      %45 = vector.broadcast %cst_24 : f32 to vector<1x256xf32>
      %c0_25 = arith.constant 0 : index
      %c0_26 = arith.constant 0 : index
      %46 = vector.load %arg4[%c0_25, %c0_26] : memref<1x256xf32, #tpu.memory_space<vmem>>, vector<1x256xf32>
      tpu.vector_store %arg4[%c0_25, %c0_26], %45 {strides = array<i32>} : memref<1x256xf32, #tpu.memory_space<vmem>>, vector<1x256xf32>,
      %cst_27 = arith.constant 0.000000e+00 : f32
      %47 = vector.broadcast %cst_27 : f32 to vector<1x256xf32>
      %c0_28 = arith.constant 0 : index
      %c0_29 = arith.constant 0 : index
      %48 = vector.load %arg5[%c0_28, %c0_29] : memref<1x256xf32, #tpu.memory_space<vmem>>, vector<1x256xf32>
      tpu.vector_store %arg5[%c0_28, %c0_29], %47 {strides = array<i32>} : memref<1x256xf32, #tpu.memory_space<vmem>>, vector<1x256xf32>,
      %cst_30 = arith.constant 0.000000e+00 : f32
      %49 = vector.broadcast %cst_30 : f32 to vector<1x256xf32>
      %c0_31 = arith.constant 0 : index
      %c0_32 = arith.constant 0 : index
      %50 = vector.load %arg6[%c0_31, %c0_32] : memref<1x256xf32, #tpu.memory_space<vmem>>, vector<1x256xf32>
      tpu.vector_store %arg6[%c0_31, %c0_32], %49 {strides = array<i32>} : memref<1x256xf32, #tpu.memory_space<vmem>>, vector<1x256xf32>,
    } else {
    }
    %c0 = arith.constant 0 : index
    %c0_1 = arith.constant 0 : index
    %3 = vector.load %arg1[%c0, %c0_1] : memref<24x256xf32, #tpu.memory_space<vmem>>, vector<24x256xf32>
    %c0_2 = arith.constant 0 : index
    %c0_3 = arith.constant 0 : index
    %4 = vector.load %arg2[%c0_2, %c0_3] : memref<1x256xi32, #tpu.memory_space<vmem>>, vector<1x256xi32>
    %cst = arith.constant dense<0xFF800000> : vector<256xf32>
    %5 = vector.multi_reduction <maximumf>, %3, %cst [0] : vector<24x256xf32> to vector<256xf32>
    %6 = vector.shape_cast %5 : vector<256xf32> to vector<1x256xf32>
    %7 = vector.broadcast %6 : vector<1x256xf32> to vector<24x256xf32>
    %8 = arith.subf %3, %7 : vector<24x256xf32>
    %9 = math.exp %8 : vector<24x256xf32>
    %cst_4 = arith.constant dense<0.000000e+00> : vector<256xf32>
    %10 = vector.multi_reduction <add>, %9, %cst_4 [0] : vector<24x256xf32> to vector<256xf32>
    %11 = vector.shape_cast %10 : vector<256xf32> to vector<1x256xf32>
    %12 = math.log %11 : vector<1x256xf32>
    %13 = arith.addf %12, %6 : vector<1x256xf32>
    %14 = tpu.iota {dimensions = array<i32: 0>} : vector<24x256xi32>
    %15 = vector.broadcast %4 : vector<1x256xi32> to vector<24x256xi32>
    %16 = arith.cmpi eq, %14, %15 : vector<24x256xi32>
    %cst_5 = arith.constant 0.000000e+00 : f32
    %17 = vector.broadcast %cst_5 : f32 to vector<24x256xf32>
    %18 = arith.select %16, %3, %17 : vector<24x256xi1>, vector<24x256xf32>
    %cst_6 = arith.constant dense<0.000000e+00> : vector<256xf32>
    %19 = vector.multi_reduction <add>, %18, %cst_6 [0] : vector<24x256xf32> to vector<256xf32>
    %20 = vector.shape_cast %19 : vector<256xf32> to vector<1x256xf32>
    %c255_i32 = arith.constant 255 : i32
    %21 = vector.broadcast %c255_i32 : i32 to vector<1x256xi32>
    %22 = arith.cmpi ne, %4, %21 : vector<1x256xi32>
    %c0_7 = arith.constant 0 : index
    %c0_8 = arith.constant 0 : index
    %23 = vector.load %arg4[%c0_7, %c0_8] : memref<1x256xf32, #tpu.memory_space<vmem>>, vector<1x256xf32>
    %24 = arith.subf %13, %20 : vector<1x256xf32>
    %cst_9 = arith.constant 0.000000e+00 : f32
    %25 = vector.broadcast %cst_9 : f32 to vector<1x256xf32>
    %26 = arith.select %22, %24, %25 : vector<1x256xi1>, vector<1x256xf32>
    %27 = arith.addf %23, %26 : vector<1x256xf32>
    %c0_10 = arith.constant 0 : index
    %c0_11 = arith.constant 0 : index
    %28 = vector.load %arg4[%c0_10, %c0_11] : memref<1x256xf32, #tpu.memory_space<vmem>>, vector<1x256xf32>
    tpu.vector_store %arg4[%c0_10, %c0_11], %27 {strides = array<i32>} : memref<1x256xf32, #tpu.memory_space<vmem>>, vector<1x256xf32>,
    %c0_12 = arith.constant 0 : index
    %c0_13 = arith.constant 0 : index
    %29 = vector.load %arg5[%c0_12, %c0_13] : memref<1x256xf32, #tpu.memory_space<vmem>>, vector<1x256xf32>
    %cst_14 = arith.constant 1.000000e+00 : f32
    %30 = vector.broadcast %cst_14 : f32 to vector<1x256xf32>
    %31 = arith.subf %30, %20 : vector<1x256xf32>
    %32 = arith.mulf %31, %31 : vector<1x256xf32>
    %cst_15 = arith.constant 0.000000e+00 : f32
    %33 = vector.broadcast %cst_15 : f32 to vector<1x256xf32>
    %34 = arith.select %22, %32, %33 : vector<1x256xi1>, vector<1x256xf32>
    %35 = arith.addf %29, %34 : vector<1x256xf32>
    %c0_16 = arith.constant 0 : index
    %c0_17 = arith.constant 0 : index
    %36 = vector.load %arg5[%c0_16, %c0_17] : memref<1x256xf32, #tpu.memory_space<vmem>>, vector<1x256xf32>
    tpu.vector_store %arg5[%c0_16, %c0_17], %35 {strides = array<i32>} : memref<1x256xf32, #tpu.memory_space<vmem>>, vector<1x256xf32>,
    %c0_18 = arith.constant 0 : index
    %c0_19 = arith.constant 0 : index
    %37 = vector.load %arg6[%c0_18, %c0_19] : memref<1x256xf32, #tpu.memory_space<vmem>>, vector<1x256xf32>
    %38 = arith.extui %22 : vector<1x256xi1> to vector<1x256xi32>
    %39 = arith.sitofp %38 : vector<1x256xi32> to vector<1x256xf32>
    %40 = arith.addf %37, %39 : vector<1x256xf32>
    %c0_20 = arith.constant 0 : index
    %c0_21 = arith.constant 0 : index
    %41 = vector.load %arg6[%c0_20, %c0_21] : memref<1x256xf32, #tpu.memory_space<vmem>>, vector<1x256xf32>
    tpu.vector_store %arg6[%c0_20, %c0_21], %40 {strides = array<i32>} : memref<1x256xf32, #tpu.memory_space<vmem>>, vector<1x256xf32>,
    %c0_i32_22 = arith.constant 0 : i32
    %42 = arith.cmpi eq, %arg0, %c0_i32_22 : i32
    %43 = arith.extui %42 : i1 to i32
    %c0_i32_23 = arith.constant 0 : i32
    %44 = arith.cmpi ne, %43, %c0_i32_23 : i32
    scf.if %44 {
      %c0_24 = arith.constant 0 : index
      %c0_25 = arith.constant 0 : index
      %45 = vector.load %arg4[%c0_24, %c0_25] : memref<1x256xf32, #tpu.memory_space<vmem>>, vector<1x256xf32>
      %46 = vector.shape_cast %45 : vector<1x256xf32> to vector<1x1x256xf32>
      %cst_26 = arith.constant dense<0.000000e+00> : vector<1xf32>
      %47 = vector.multi_reduction <add>, %46, %cst_26 [1, 2] : vector<1x1x256xf32> to vector<1xf32>
      %48 = vector.shape_cast %47 : vector<1xf32> to vector<1x1x1xf32>
      %49 = vector.extract %48[0, 0, 0] : f32 from vector<1x1x1xf32>
      %c0_27 = arith.constant 0 : index
      %50 = memref.load %arg3[%c0_27] : memref<3xf32, #tpu.memory_space<smem>>
      memref.store %49, %arg3[%c0_27] : memref<3xf32, #tpu.memory_space<smem>>
      %c0_28 = arith.constant 0 : index
      %c0_29 = arith.constant 0 : index
      %51 = vector.load %arg5[%c0_28, %c0_29] : memref<1x256xf32, #tpu.memory_space<vmem>>, vector<1x256xf32>
      %52 = vector.shape_cast %51 : vector<1x256xf32> to vector<1x1x256xf32>
      %cst_30 = arith.constant dense<0.000000e+00> : vector<1xf32>
      %53 = vector.multi_reduction <add>, %52, %cst_30 [1, 2] : vector<1x1x256xf32> to vector<1xf32>
      %54 = vector.shape_cast %53 : vector<1xf32> to vector<1x1x1xf32>
      %55 = vector.extract %54[0, 0, 0] : f32 from vector<1x1x1xf32>
      %c1 = arith.constant 1 : index
      %56 = memref.load %arg3[%c1] : memref<3xf32, #tpu.memory_space<smem>>
      memref.store %55, %arg3[%c1] : memref<3xf32, #tpu.memory_space<smem>>
      %c0_31 = arith.constant 0 : index
      %c0_32 = arith.constant 0 : index
      %57 = vector.load %arg6[%c0_31, %c0_32] : memref<1x256xf32, #tpu.memory_space<vmem>>, vector<1x256xf32>
      %58 = vector.shape_cast %57 : vector<1x256xf32> to vector<1x1x256xf32>
      %cst_33 = arith.constant dense<0.000000e+00> : vector<1xf32>
      %59 = vector.multi_reduction <add>, %58, %cst_33 [1, 2] : vector<1x1x256xf32> to vector<1xf32>
      %60 = vector.shape_cast %59 : vector<1xf32> to vector<1x1x1xf32>
      %61 = vector.extract %60[0, 0, 0] : f32 from vector<1x1x1xf32>
      %c2 = arith.constant 2 : index
      %62 = memref.load %arg3[%c2] : memref<3xf32, #tpu.memory_space<smem>>
      memref.store %61, %arg3[%c2] : memref<3xf32, #tpu.memory_space<smem>>
    } else {
    }
    return
  }
  func.func @transform_0(%arg0: i32) -> (i32, i32) {
    %c0_i32 = arith.constant 0 : i32
    %c0_i32_0 = arith.constant 0 : i32
    return %c0_i32, %arg0 : i32, i32
  }
  func.func @transform_1(%arg0: i32) -> (i32, i32) {
    %c0_i32 = arith.constant 0 : i32
    %c0_i32_0 = arith.constant 0 : i32
    return %c0_i32, %arg0 : i32, i32
  }
  func.func @transform_2(%arg0: i32) -> i32 {
    %c0_i32 = arith.constant 0 : i32
    %c0_i32_0 = arith.constant 0 : i32
    return %c0_i32 : i32
  }
}

module attributes {stable_mosaic.version = 11 : i64} {
  func.func @_fused_interp_ce_kernel(%arg0: i32, %arg1: i32, %arg2: memref<1x8x8x8xf32, #tpu.memory_space<vmem>>, %arg3: memref<16x8xf32, #tpu.memory_space<vmem>>, %arg4: memref<8x16xf32, #tpu.memory_space<vmem>>, %arg5: memref<1x16x16xi32, #tpu.memory_space<vmem>>, %arg6: memref<1x8x128xf32, #tpu.memory_space<vmem>>, %arg7: memref<8x8x16xf32, #tpu.memory_space<vmem>>, %arg8: memref<16x16xf32, #tpu.memory_space<vmem>>, %arg9: memref<16x16xf32, #tpu.memory_space<vmem>>) attributes {dimension_semantics = [#tpu.dimension_semantics<parallel>, #tpu.dimension_semantics<arbitrary>], iteration_bounds = array<i64: 2, 1>, scalar_prefetch = 0 : i64, scratch_operands = 3 : i64, tpu.core_type = #tpu.core_type<tc>, window_params = [{transform_indices = @transform_0, window_bounds = array<i64: 1, 8, 8, 8>}, {transform_indices = @transform_1, window_bounds = array<i64: 16, 8>}, {pipeline_mode = #tpu.pipeline_mode<synchronous>, transform_indices = @transform_2, window_bounds = array<i64: 8, 16>}, {transform_indices = @transform_3, window_bounds = array<i64: 1, 16, 16>}, {transform_indices = @transform_4, window_bounds = array<i64: 1, 8, 128>}]} {
    %c0_i32 = arith.constant 0 : i32
    %0 = arith.cmpi eq, %arg1, %c0_i32 : i32
    %1 = arith.extui %0 : i1 to i32
    %c0_i32_0 = arith.constant 0 : i32
    %2 = arith.cmpi ne, %1, %c0_i32_0 : i32
    scf.if %2 {
      %c0_36 = arith.constant 0 : index
      %c0_37 = arith.constant 0 : index
      %c0_38 = arith.constant 0 : index
      %c0_39 = arith.constant 0 : index
      %120 = vector.load %arg2[%c0_36, %c0_37, %c0_38, %c0_39] : memref<1x8x8x8xf32, #tpu.memory_space<vmem>>, vector<1x8x8x8xf32>
      %121 = vector.shape_cast %120 : vector<1x8x8x8xf32> to vector<8x8x8xf32>
      %c0_40 = arith.constant 0 : index
      %c0_41 = arith.constant 0 : index
      %122 = vector.load %arg4[%c0_40, %c0_41] : memref<8x16xf32, #tpu.memory_space<vmem>>, vector<8x16xf32>
      %123 = vector.extract_strided_slice %121 {offsets = [0, 0, 0], sizes = [1, 8, 8], strides = [1, 1, 1]} : vector<8x8x8xf32> to vector<1x8x8xf32>
      %124 = vector.shape_cast %123 : vector<1x8x8xf32> to vector<8x8xf32>
      %cst_42 = arith.constant dense<0.000000e+00> : vector<8x16xf32>
      %125 = tpu.matmul %124, %122, %cst_42 {dimension_numbers = #tpu.dot_dimension_numbers<[1], [0], [0], [1], [0, 0, 1, 1], [], []>} : vector<8x8xf32>, vector<8x16xf32>, vector<8x16xf32> -> vector<8x16xf32>
      %c0_43 = arith.constant 0 : index
      %c0_44 = arith.constant 0 : index
      %c0_45 = arith.constant 0 : index
      %126 = vector.load %arg7[%c0_43, %c0_44, %c0_45] : memref<8x8x16xf32, #tpu.memory_space<vmem>>, vector<1x8x16xf32>
      %127 = vector.shape_cast %126 : vector<1x8x16xf32> to vector<8x16xf32>
      %128 = vector.shape_cast %125 : vector<8x16xf32> to vector<1x8x16xf32>
      tpu.vector_store %arg7[%c0_43, %c0_44, %c0_45], %128 {strides = array<i32>} : memref<8x8x16xf32, #tpu.memory_space<vmem>>, vector<1x8x16xf32>,
      %129 = vector.extract_strided_slice %121 {offsets = [1, 0, 0], sizes = [1, 8, 8], strides = [1, 1, 1]} : vector<8x8x8xf32> to vector<1x8x8xf32>
      %130 = vector.shape_cast %129 : vector<1x8x8xf32> to vector<8x8xf32>
      %cst_46 = arith.constant dense<0.000000e+00> : vector<8x16xf32>
      %131 = tpu.matmul %130, %122, %cst_46 {dimension_numbers = #tpu.dot_dimension_numbers<[1], [0], [0], [1], [0, 0, 1, 1], [], []>} : vector<8x8xf32>, vector<8x16xf32>, vector<8x16xf32> -> vector<8x16xf32>
      %c1 = arith.constant 1 : index
      %c0_47 = arith.constant 0 : index
      %c0_48 = arith.constant 0 : index
      %132 = vector.load %arg7[%c1, %c0_47, %c0_48] : memref<8x8x16xf32, #tpu.memory_space<vmem>>, vector<1x8x16xf32>
      %133 = vector.shape_cast %132 : vector<1x8x16xf32> to vector<8x16xf32>
      %134 = vector.shape_cast %131 : vector<8x16xf32> to vector<1x8x16xf32>
      tpu.vector_store %arg7[%c1, %c0_47, %c0_48], %134 {strides = array<i32>} : memref<8x8x16xf32, #tpu.memory_space<vmem>>, vector<1x8x16xf32>,
      %135 = vector.extract_strided_slice %121 {offsets = [2, 0, 0], sizes = [1, 8, 8], strides = [1, 1, 1]} : vector<8x8x8xf32> to vector<1x8x8xf32>
      %136 = vector.shape_cast %135 : vector<1x8x8xf32> to vector<8x8xf32>
      %cst_49 = arith.constant dense<0.000000e+00> : vector<8x16xf32>
      %137 = tpu.matmul %136, %122, %cst_49 {dimension_numbers = #tpu.dot_dimension_numbers<[1], [0], [0], [1], [0, 0, 1, 1], [], []>} : vector<8x8xf32>, vector<8x16xf32>, vector<8x16xf32> -> vector<8x16xf32>
      %c2 = arith.constant 2 : index
      %c0_50 = arith.constant 0 : index
      %c0_51 = arith.constant 0 : index
      %138 = vector.load %arg7[%c2, %c0_50, %c0_51] : memref<8x8x16xf32, #tpu.memory_space<vmem>>, vector<1x8x16xf32>
      %139 = vector.shape_cast %138 : vector<1x8x16xf32> to vector<8x16xf32>
      %140 = vector.shape_cast %137 : vector<8x16xf32> to vector<1x8x16xf32>
      tpu.vector_store %arg7[%c2, %c0_50, %c0_51], %140 {strides = array<i32>} : memref<8x8x16xf32, #tpu.memory_space<vmem>>, vector<1x8x16xf32>,
      %141 = vector.extract_strided_slice %121 {offsets = [3, 0, 0], sizes = [1, 8, 8], strides = [1, 1, 1]} : vector<8x8x8xf32> to vector<1x8x8xf32>
      %142 = vector.shape_cast %141 : vector<1x8x8xf32> to vector<8x8xf32>
      %cst_52 = arith.constant dense<0.000000e+00> : vector<8x16xf32>
      %143 = tpu.matmul %142, %122, %cst_52 {dimension_numbers = #tpu.dot_dimension_numbers<[1], [0], [0], [1], [0, 0, 1, 1], [], []>} : vector<8x8xf32>, vector<8x16xf32>, vector<8x16xf32> -> vector<8x16xf32>
      %c3 = arith.constant 3 : index
      %c0_53 = arith.constant 0 : index
      %c0_54 = arith.constant 0 : index
      %144 = vector.load %arg7[%c3, %c0_53, %c0_54] : memref<8x8x16xf32, #tpu.memory_space<vmem>>, vector<1x8x16xf32>
      %145 = vector.shape_cast %144 : vector<1x8x16xf32> to vector<8x16xf32>
      %146 = vector.shape_cast %143 : vector<8x16xf32> to vector<1x8x16xf32>
      tpu.vector_store %arg7[%c3, %c0_53, %c0_54], %146 {strides = array<i32>} : memref<8x8x16xf32, #tpu.memory_space<vmem>>, vector<1x8x16xf32>,
      %147 = vector.extract_strided_slice %121 {offsets = [4, 0, 0], sizes = [1, 8, 8], strides = [1, 1, 1]} : vector<8x8x8xf32> to vector<1x8x8xf32>
      %148 = vector.shape_cast %147 : vector<1x8x8xf32> to vector<8x8xf32>
      %cst_55 = arith.constant dense<0.000000e+00> : vector<8x16xf32>
      %149 = tpu.matmul %148, %122, %cst_55 {dimension_numbers = #tpu.dot_dimension_numbers<[1], [0], [0], [1], [0, 0, 1, 1], [], []>} : vector<8x8xf32>, vector<8x16xf32>, vector<8x16xf32> -> vector<8x16xf32>
      %c4 = arith.constant 4 : index
      %c0_56 = arith.constant 0 : index
      %c0_57 = arith.constant 0 : index
      %150 = vector.load %arg7[%c4, %c0_56, %c0_57] : memref<8x8x16xf32, #tpu.memory_space<vmem>>, vector<1x8x16xf32>
      %151 = vector.shape_cast %150 : vector<1x8x16xf32> to vector<8x16xf32>
      %152 = vector.shape_cast %149 : vector<8x16xf32> to vector<1x8x16xf32>
      tpu.vector_store %arg7[%c4, %c0_56, %c0_57], %152 {strides = array<i32>} : memref<8x8x16xf32, #tpu.memory_space<vmem>>, vector<1x8x16xf32>,
      %153 = vector.extract_strided_slice %121 {offsets = [5, 0, 0], sizes = [1, 8, 8], strides = [1, 1, 1]} : vector<8x8x8xf32> to vector<1x8x8xf32>
      %154 = vector.shape_cast %153 : vector<1x8x8xf32> to vector<8x8xf32>
      %cst_58 = arith.constant dense<0.000000e+00> : vector<8x16xf32>
      %155 = tpu.matmul %154, %122, %cst_58 {dimension_numbers = #tpu.dot_dimension_numbers<[1], [0], [0], [1], [0, 0, 1, 1], [], []>} : vector<8x8xf32>, vector<8x16xf32>, vector<8x16xf32> -> vector<8x16xf32>
      %c5 = arith.constant 5 : index
      %c0_59 = arith.constant 0 : index
      %c0_60 = arith.constant 0 : index
      %156 = vector.load %arg7[%c5, %c0_59, %c0_60] : memref<8x8x16xf32, #tpu.memory_space<vmem>>, vector<1x8x16xf32>
      %157 = vector.shape_cast %156 : vector<1x8x16xf32> to vector<8x16xf32>
      %158 = vector.shape_cast %155 : vector<8x16xf32> to vector<1x8x16xf32>
      tpu.vector_store %arg7[%c5, %c0_59, %c0_60], %158 {strides = array<i32>} : memref<8x8x16xf32, #tpu.memory_space<vmem>>, vector<1x8x16xf32>,
      %159 = vector.extract_strided_slice %121 {offsets = [6, 0, 0], sizes = [1, 8, 8], strides = [1, 1, 1]} : vector<8x8x8xf32> to vector<1x8x8xf32>
      %160 = vector.shape_cast %159 : vector<1x8x8xf32> to vector<8x8xf32>
      %cst_61 = arith.constant dense<0.000000e+00> : vector<8x16xf32>
      %161 = tpu.matmul %160, %122, %cst_61 {dimension_numbers = #tpu.dot_dimension_numbers<[1], [0], [0], [1], [0, 0, 1, 1], [], []>} : vector<8x8xf32>, vector<8x16xf32>, vector<8x16xf32> -> vector<8x16xf32>
      %c6 = arith.constant 6 : index
      %c0_62 = arith.constant 0 : index
      %c0_63 = arith.constant 0 : index
      %162 = vector.load %arg7[%c6, %c0_62, %c0_63] : memref<8x8x16xf32, #tpu.memory_space<vmem>>, vector<1x8x16xf32>
      %163 = vector.shape_cast %162 : vector<1x8x16xf32> to vector<8x16xf32>
      %164 = vector.shape_cast %161 : vector<8x16xf32> to vector<1x8x16xf32>
      tpu.vector_store %arg7[%c6, %c0_62, %c0_63], %164 {strides = array<i32>} : memref<8x8x16xf32, #tpu.memory_space<vmem>>, vector<1x8x16xf32>,
      %165 = vector.extract_strided_slice %121 {offsets = [7, 0, 0], sizes = [1, 8, 8], strides = [1, 1, 1]} : vector<8x8x8xf32> to vector<1x8x8xf32>
      %166 = vector.shape_cast %165 : vector<1x8x8xf32> to vector<8x8xf32>
      %cst_64 = arith.constant dense<0.000000e+00> : vector<8x16xf32>
      %167 = tpu.matmul %166, %122, %cst_64 {dimension_numbers = #tpu.dot_dimension_numbers<[1], [0], [0], [1], [0, 0, 1, 1], [], []>} : vector<8x8xf32>, vector<8x16xf32>, vector<8x16xf32> -> vector<8x16xf32>
      %c7 = arith.constant 7 : index
      %c0_65 = arith.constant 0 : index
      %c0_66 = arith.constant 0 : index
      %168 = vector.load %arg7[%c7, %c0_65, %c0_66] : memref<8x8x16xf32, #tpu.memory_space<vmem>>, vector<1x8x16xf32>
      %169 = vector.shape_cast %168 : vector<1x8x16xf32> to vector<8x16xf32>
      %170 = vector.shape_cast %167 : vector<8x16xf32> to vector<1x8x16xf32>
      tpu.vector_store %arg7[%c7, %c0_65, %c0_66], %170 {strides = array<i32>} : memref<8x8x16xf32, #tpu.memory_space<vmem>>, vector<1x8x16xf32>,
      %cst_67 = arith.constant 0.000000e+00 : f32
      %171 = vector.broadcast %cst_67 : f32 to vector<16x16xf32>
      %c0_68 = arith.constant 0 : index
      %c0_69 = arith.constant 0 : index
      %172 = vector.load %arg8[%c0_68, %c0_69] : memref<16x16xf32, #tpu.memory_space<vmem>>, vector<16x16xf32>
      tpu.vector_store %arg8[%c0_68, %c0_69], %171 {strides = array<i32>} : memref<16x16xf32, #tpu.memory_space<vmem>>, vector<16x16xf32>,
      %cst_70 = arith.constant 0.000000e+00 : f32
      %173 = vector.broadcast %cst_70 : f32 to vector<16x16xf32>
      %c0_71 = arith.constant 0 : index
      %c0_72 = arith.constant 0 : index
      %174 = vector.load %arg9[%c0_71, %c0_72] : memref<16x16xf32, #tpu.memory_space<vmem>>, vector<16x16xf32>
      tpu.vector_store %arg9[%c0_71, %c0_72], %173 {strides = array<i32>} : memref<16x16xf32, #tpu.memory_space<vmem>>, vector<16x16xf32>,
    } else {
    }
    %c0 = arith.constant 0 : index
    %c0_1 = arith.constant 0 : index
    %3 = vector.load %arg3[%c0, %c0_1] : memref<16x8xf32, #tpu.memory_space<vmem>>, vector<16x8xf32>
    %c0_2 = arith.constant 0 : index
    %c0_3 = arith.constant 0 : index
    %c0_4 = arith.constant 0 : index
    %4 = vector.load %arg7[%c0_2, %c0_3, %c0_4] : memref<8x8x16xf32, #tpu.memory_space<vmem>>, vector<8x8x16xf32>
    %5 = vector.extract_strided_slice %4 {offsets = [0, 0, 0], sizes = [1, 8, 16], strides = [1, 1, 1]} : vector<8x8x16xf32> to vector<1x8x16xf32>
    %6 = vector.shape_cast %5 : vector<1x8x16xf32> to vector<8x16xf32>
    %cst = arith.constant dense<0.000000e+00> : vector<16x16xf32>
    %7 = tpu.matmul %3, %6, %cst {dimension_numbers = #tpu.dot_dimension_numbers<[1], [0], [0], [1], [0, 0, 1, 1], [], []>} : vector<16x8xf32>, vector<8x16xf32>, vector<16x16xf32> -> vector<16x16xf32>
    %8 = vector.extract_strided_slice %4 {offsets = [1, 0, 0], sizes = [1, 8, 16], strides = [1, 1, 1]} : vector<8x8x16xf32> to vector<1x8x16xf32>
    %9 = vector.shape_cast %8 : vector<1x8x16xf32> to vector<8x16xf32>
    %cst_5 = arith.constant dense<0.000000e+00> : vector<16x16xf32>
    %10 = tpu.matmul %3, %9, %cst_5 {dimension_numbers = #tpu.dot_dimension_numbers<[1], [0], [0], [1], [0, 0, 1, 1], [], []>} : vector<16x8xf32>, vector<8x16xf32>, vector<16x16xf32> -> vector<16x16xf32>
    %11 = vector.extract_strided_slice %4 {offsets = [2, 0, 0], sizes = [1, 8, 16], strides = [1, 1, 1]} : vector<8x8x16xf32> to vector<1x8x16xf32>
    %12 = vector.shape_cast %11 : vector<1x8x16xf32> to vector<8x16xf32>
    %cst_6 = arith.constant dense<0.000000e+00> : vector<16x16xf32>
    %13 = tpu.matmul %3, %12, %cst_6 {dimension_numbers = #tpu.dot_dimension_numbers<[1], [0], [0], [1], [0, 0, 1, 1], [], []>} : vector<16x8xf32>, vector<8x16xf32>, vector<16x16xf32> -> vector<16x16xf32>
    %14 = vector.extract_strided_slice %4 {offsets = [3, 0, 0], sizes = [1, 8, 16], strides = [1, 1, 1]} : vector<8x8x16xf32> to vector<1x8x16xf32>
    %15 = vector.shape_cast %14 : vector<1x8x16xf32> to vector<8x16xf32>
    %cst_7 = arith.constant dense<0.000000e+00> : vector<16x16xf32>
    %16 = tpu.matmul %3, %15, %cst_7 {dimension_numbers = #tpu.dot_dimension_numbers<[1], [0], [0], [1], [0, 0, 1, 1], [], []>} : vector<16x8xf32>, vector<8x16xf32>, vector<16x16xf32> -> vector<16x16xf32>
    %17 = vector.extract_strided_slice %4 {offsets = [4, 0, 0], sizes = [1, 8, 16], strides = [1, 1, 1]} : vector<8x8x16xf32> to vector<1x8x16xf32>
    %18 = vector.shape_cast %17 : vector<1x8x16xf32> to vector<8x16xf32>
    %cst_8 = arith.constant dense<0.000000e+00> : vector<16x16xf32>
    %19 = tpu.matmul %3, %18, %cst_8 {dimension_numbers = #tpu.dot_dimension_numbers<[1], [0], [0], [1], [0, 0, 1, 1], [], []>} : vector<16x8xf32>, vector<8x16xf32>, vector<16x16xf32> -> vector<16x16xf32>
    %20 = vector.extract_strided_slice %4 {offsets = [5, 0, 0], sizes = [1, 8, 16], strides = [1, 1, 1]} : vector<8x8x16xf32> to vector<1x8x16xf32>
    %21 = vector.shape_cast %20 : vector<1x8x16xf32> to vector<8x16xf32>
    %cst_9 = arith.constant dense<0.000000e+00> : vector<16x16xf32>
    %22 = tpu.matmul %3, %21, %cst_9 {dimension_numbers = #tpu.dot_dimension_numbers<[1], [0], [0], [1], [0, 0, 1, 1], [], []>} : vector<16x8xf32>, vector<8x16xf32>, vector<16x16xf32> -> vector<16x16xf32>
    %23 = vector.extract_strided_slice %4 {offsets = [6, 0, 0], sizes = [1, 8, 16], strides = [1, 1, 1]} : vector<8x8x16xf32> to vector<1x8x16xf32>
    %24 = vector.shape_cast %23 : vector<1x8x16xf32> to vector<8x16xf32>
    %cst_10 = arith.constant dense<0.000000e+00> : vector<16x16xf32>
    %25 = tpu.matmul %3, %24, %cst_10 {dimension_numbers = #tpu.dot_dimension_numbers<[1], [0], [0], [1], [0, 0, 1, 1], [], []>} : vector<16x8xf32>, vector<8x16xf32>, vector<16x16xf32> -> vector<16x16xf32>
    %26 = vector.extract_strided_slice %4 {offsets = [7, 0, 0], sizes = [1, 8, 16], strides = [1, 1, 1]} : vector<8x8x16xf32> to vector<1x8x16xf32>
    %27 = vector.shape_cast %26 : vector<1x8x16xf32> to vector<8x16xf32>
    %cst_11 = arith.constant dense<0.000000e+00> : vector<16x16xf32>
    %28 = tpu.matmul %3, %27, %cst_11 {dimension_numbers = #tpu.dot_dimension_numbers<[1], [0], [0], [1], [0, 0, 1, 1], [], []>} : vector<16x8xf32>, vector<8x16xf32>, vector<16x16xf32> -> vector<16x16xf32>
    %c0_12 = arith.constant 0 : index
    %c0_13 = arith.constant 0 : index
    %c0_14 = arith.constant 0 : index
    %29 = vector.load %arg5[%c0_12, %c0_13, %c0_14] : memref<1x16x16xi32, #tpu.memory_space<vmem>>, vector<1x16x16xi32>
    %30 = vector.shape_cast %29 : vector<1x16x16xi32> to vector<16x16xi32>
    %31 = arith.maximumf %7, %10 : vector<16x16xf32>
    %32 = arith.maximumf %31, %13 : vector<16x16xf32>
    %33 = arith.maximumf %32, %16 : vector<16x16xf32>
    %34 = arith.maximumf %33, %19 : vector<16x16xf32>
    %35 = arith.maximumf %34, %22 : vector<16x16xf32>
    %36 = arith.maximumf %35, %25 : vector<16x16xf32>
    %37 = arith.maximumf %36, %28 : vector<16x16xf32>
    %38 = arith.subf %7, %37 : vector<16x16xf32>
    %39 = math.exp %38 : vector<16x16xf32>
    %40 = arith.subf %10, %37 : vector<16x16xf32>
    %41 = math.exp %40 : vector<16x16xf32>
    %42 = arith.addf %39, %41 : vector<16x16xf32>
    %43 = arith.subf %13, %37 : vector<16x16xf32>
    %44 = math.exp %43 : vector<16x16xf32>
    %45 = arith.addf %42, %44 : vector<16x16xf32>
    %46 = arith.subf %16, %37 : vector<16x16xf32>
    %47 = math.exp %46 : vector<16x16xf32>
    %48 = arith.addf %45, %47 : vector<16x16xf32>
    %49 = arith.subf %19, %37 : vector<16x16xf32>
    %50 = math.exp %49 : vector<16x16xf32>
    %51 = arith.addf %48, %50 : vector<16x16xf32>
    %52 = arith.subf %22, %37 : vector<16x16xf32>
    %53 = math.exp %52 : vector<16x16xf32>
    %54 = arith.addf %51, %53 : vector<16x16xf32>
    %55 = arith.subf %25, %37 : vector<16x16xf32>
    %56 = math.exp %55 : vector<16x16xf32>
    %57 = arith.addf %54, %56 : vector<16x16xf32>
    %58 = arith.subf %28, %37 : vector<16x16xf32>
    %59 = math.exp %58 : vector<16x16xf32>
    %60 = arith.addf %57, %59 : vector<16x16xf32>
    %61 = math.log %60 : vector<16x16xf32>
    %62 = arith.addf %61, %37 : vector<16x16xf32>
    %cst_15 = arith.constant 0.000000e+00 : f32
    %63 = vector.broadcast %cst_15 : f32 to vector<16x16xf32>
    %c0_i32_16 = arith.constant 0 : i32
    %64 = vector.broadcast %c0_i32_16 : i32 to vector<16x16xi32>
    %65 = arith.cmpi eq, %30, %64 : vector<16x16xi32>
    %cst_17 = arith.constant 0.000000e+00 : f32
    %66 = vector.broadcast %cst_17 : f32 to vector<16x16xf32>
    %67 = arith.select %65, %7, %66 : vector<16x16xi1>, vector<16x16xf32>
    %68 = arith.addf %63, %67 : vector<16x16xf32>
    %c1_i32 = arith.constant 1 : i32
    %69 = vector.broadcast %c1_i32 : i32 to vector<16x16xi32>
    %70 = arith.cmpi eq, %30, %69 : vector<16x16xi32>
    %cst_18 = arith.constant 0.000000e+00 : f32
    %71 = vector.broadcast %cst_18 : f32 to vector<16x16xf32>
    %72 = arith.select %70, %10, %71 : vector<16x16xi1>, vector<16x16xf32>
    %73 = arith.addf %68, %72 : vector<16x16xf32>
    %c2_i32 = arith.constant 2 : i32
    %74 = vector.broadcast %c2_i32 : i32 to vector<16x16xi32>
    %75 = arith.cmpi eq, %30, %74 : vector<16x16xi32>
    %cst_19 = arith.constant 0.000000e+00 : f32
    %76 = vector.broadcast %cst_19 : f32 to vector<16x16xf32>
    %77 = arith.select %75, %13, %76 : vector<16x16xi1>, vector<16x16xf32>
    %78 = arith.addf %73, %77 : vector<16x16xf32>
    %c3_i32 = arith.constant 3 : i32
    %79 = vector.broadcast %c3_i32 : i32 to vector<16x16xi32>
    %80 = arith.cmpi eq, %30, %79 : vector<16x16xi32>
    %cst_20 = arith.constant 0.000000e+00 : f32
    %81 = vector.broadcast %cst_20 : f32 to vector<16x16xf32>
    %82 = arith.select %80, %16, %81 : vector<16x16xi1>, vector<16x16xf32>
    %83 = arith.addf %78, %82 : vector<16x16xf32>
    %c4_i32 = arith.constant 4 : i32
    %84 = vector.broadcast %c4_i32 : i32 to vector<16x16xi32>
    %85 = arith.cmpi eq, %30, %84 : vector<16x16xi32>
    %cst_21 = arith.constant 0.000000e+00 : f32
    %86 = vector.broadcast %cst_21 : f32 to vector<16x16xf32>
    %87 = arith.select %85, %19, %86 : vector<16x16xi1>, vector<16x16xf32>
    %88 = arith.addf %83, %87 : vector<16x16xf32>
    %c5_i32 = arith.constant 5 : i32
    %89 = vector.broadcast %c5_i32 : i32 to vector<16x16xi32>
    %90 = arith.cmpi eq, %30, %89 : vector<16x16xi32>
    %cst_22 = arith.constant 0.000000e+00 : f32
    %91 = vector.broadcast %cst_22 : f32 to vector<16x16xf32>
    %92 = arith.select %90, %22, %91 : vector<16x16xi1>, vector<16x16xf32>
    %93 = arith.addf %88, %92 : vector<16x16xf32>
    %c6_i32 = arith.constant 6 : i32
    %94 = vector.broadcast %c6_i32 : i32 to vector<16x16xi32>
    %95 = arith.cmpi eq, %30, %94 : vector<16x16xi32>
    %cst_23 = arith.constant 0.000000e+00 : f32
    %96 = vector.broadcast %cst_23 : f32 to vector<16x16xf32>
    %97 = arith.select %95, %25, %96 : vector<16x16xi1>, vector<16x16xf32>
    %98 = arith.addf %93, %97 : vector<16x16xf32>
    %c7_i32 = arith.constant 7 : i32
    %99 = vector.broadcast %c7_i32 : i32 to vector<16x16xi32>
    %100 = arith.cmpi eq, %30, %99 : vector<16x16xi32>
    %cst_24 = arith.constant 0.000000e+00 : f32
    %101 = vector.broadcast %cst_24 : f32 to vector<16x16xf32>
    %102 = arith.select %100, %28, %101 : vector<16x16xi1>, vector<16x16xf32>
    %103 = arith.addf %98, %102 : vector<16x16xf32>
    %c255_i32 = arith.constant 255 : i32
    %104 = vector.broadcast %c255_i32 : i32 to vector<16x16xi32>
    %105 = arith.cmpi ne, %30, %104 : vector<16x16xi32>
    %c0_25 = arith.constant 0 : index
    %c0_26 = arith.constant 0 : index
    %106 = vector.load %arg8[%c0_25, %c0_26] : memref<16x16xf32, #tpu.memory_space<vmem>>, vector<16x16xf32>
    %107 = arith.subf %62, %103 : vector<16x16xf32>
    %cst_27 = arith.constant 0.000000e+00 : f32
    %108 = vector.broadcast %cst_27 : f32 to vector<16x16xf32>
    %109 = arith.select %105, %107, %108 : vector<16x16xi1>, vector<16x16xf32>
    %110 = arith.addf %106, %109 : vector<16x16xf32>
    %c0_28 = arith.constant 0 : index
    %c0_29 = arith.constant 0 : index
    %111 = vector.load %arg8[%c0_28, %c0_29] : memref<16x16xf32, #tpu.memory_space<vmem>>, vector<16x16xf32>
    tpu.vector_store %arg8[%c0_28, %c0_29], %110 {strides = array<i32>} : memref<16x16xf32, #tpu.memory_space<vmem>>, vector<16x16xf32>,
    %c0_30 = arith.constant 0 : index
    %c0_31 = arith.constant 0 : index
    %112 = vector.load %arg9[%c0_30, %c0_31] : memref<16x16xf32, #tpu.memory_space<vmem>>, vector<16x16xf32>
    %113 = arith.extui %105 : vector<16x16xi1> to vector<16x16xi32>
    %114 = arith.sitofp %113 : vector<16x16xi32> to vector<16x16xf32>
    %115 = arith.addf %112, %114 : vector<16x16xf32>
    %c0_32 = arith.constant 0 : index
    %c0_33 = arith.constant 0 : index
    %116 = vector.load %arg9[%c0_32, %c0_33] : memref<16x16xf32, #tpu.memory_space<vmem>>, vector<16x16xf32>
    tpu.vector_store %arg9[%c0_32, %c0_33], %115 {strides = array<i32>} : memref<16x16xf32, #tpu.memory_space<vmem>>, vector<16x16xf32>,
    %c0_i32_34 = arith.constant 0 : i32
    %117 = arith.cmpi eq, %arg1, %c0_i32_34 : i32
    %118 = arith.extui %117 : i1 to i32
    %c0_i32_35 = arith.constant 0 : i32
    %119 = arith.cmpi ne, %118, %c0_i32_35 : i32
    scf.if %119 {
      %c0_36 = arith.constant 0 : index
      %c0_37 = arith.constant 0 : index
      %120 = vector.load %arg8[%c0_36, %c0_37] : memref<16x16xf32, #tpu.memory_space<vmem>>, vector<16x16xf32>
      %121 = vector.shape_cast %120 : vector<16x16xf32> to vector<1x16x16xf32>
      %cst_38 = arith.constant dense<0.000000e+00> : vector<1xf32>
      %122 = vector.multi_reduction <add>, %121, %cst_38 [1, 2] : vector<1x16x16xf32> to vector<1xf32>
      %123 = vector.shape_cast %122 : vector<1xf32> to vector<1x1x1xf32>
      %124 = vector.extract %123[0, 0, 0] : f32 from vector<1x1x1xf32>
      %c0_39 = arith.constant 0 : index
      %c0_40 = arith.constant 0 : index
      %125 = vector.load %arg9[%c0_39, %c0_40] : memref<16x16xf32, #tpu.memory_space<vmem>>, vector<16x16xf32>
      %126 = vector.shape_cast %125 : vector<16x16xf32> to vector<1x16x16xf32>
      %cst_41 = arith.constant dense<0.000000e+00> : vector<1xf32>
      %127 = vector.multi_reduction <add>, %126, %cst_41 [1, 2] : vector<1x16x16xf32> to vector<1xf32>
      %128 = vector.shape_cast %127 : vector<1xf32> to vector<1x1x1xf32>
      %129 = vector.extract %128[0, 0, 0] : f32 from vector<1x1x1xf32>
      %130 = tpu.iota {dimensions = array<i32: 1>} : vector<1x8x128xi32>
      %c0_i32_42 = arith.constant 0 : i32
      %131 = vector.broadcast %c0_i32_42 : i32 to vector<1x8x128xi32>
      %132 = arith.cmpi eq, %130, %131 : vector<1x8x128xi32>
      %133 = vector.broadcast %124 : f32 to vector<1x8x128xf32>
      %134 = vector.broadcast %129 : f32 to vector<1x8x128xf32>
      %135 = arith.select %132, %133, %134 : vector<1x8x128xi1>, vector<1x8x128xf32>
      %c0_43 = arith.constant 0 : index
      %c0_44 = arith.constant 0 : index
      %c0_45 = arith.constant 0 : index
      %136 = vector.load %arg6[%c0_43, %c0_44, %c0_45] : memref<1x8x128xf32, #tpu.memory_space<vmem>>, vector<1x8x128xf32>
      tpu.vector_store %arg6[%c0_43, %c0_44, %c0_45], %135 {strides = array<i32>} : memref<1x8x128xf32, #tpu.memory_space<vmem>>, vector<1x8x128xf32>,
    } else {
    }
    return
  }
  func.func @transform_0(%arg0: i32, %arg1: i32) -> (i32, i32, i32, i32) {
    %c0_i32 = arith.constant 0 : i32
    %c0_i32_0 = arith.constant 0 : i32
    %c0_i32_1 = arith.constant 0 : i32
    %c0_i32_2 = arith.constant 0 : i32
    return %arg0, %c0_i32, %c0_i32_0, %c0_i32_1 : i32, i32, i32, i32
  }
  func.func @transform_1(%arg0: i32, %arg1: i32) -> (i32, i32) {
    %c0_i32 = arith.constant 0 : i32
    %c0_i32_0 = arith.constant 0 : i32
    return %arg1, %c0_i32 : i32, i32
  }
  func.func @transform_2(%arg0: i32, %arg1: i32) -> (i32, i32) {
    %c0_i32 = arith.constant 0 : i32
    %c0_i32_0 = arith.constant 0 : i32
    %c0_i32_1 = arith.constant 0 : i32
    return %c0_i32, %c0_i32_0 : i32, i32
  }
  func.func @transform_3(%arg0: i32, %arg1: i32) -> (i32, i32, i32) {
    %c0_i32 = arith.constant 0 : i32
    %c0_i32_0 = arith.constant 0 : i32
    return %arg0, %arg1, %c0_i32 : i32, i32, i32
  }
  func.func @transform_4(%arg0: i32, %arg1: i32) -> (i32, i32, i32) {
    %c0_i32 = arith.constant 0 : i32
    %c0_i32_0 = arith.constant 0 : i32
    %c0_i32_1 = arith.constant 0 : i32
    return %arg0, %c0_i32, %c0_i32_0 : i32, i32, i32
  }
}

</mosaic_0001>

<bundles_post_ra>
// kernel: distance_optimization_loss.3
= control target key start
LH: loop header
LB: loop body
LE: loop exit
PB: predicated region body
PF: predicated region fallthrough
CT: control target
= control target key end

     0   :  { %v16_v0 = vlaneseq  ;;  %s461_s0 = inlined_call_operand.vmem [shape: f32[24,256], index: 0, kind: input, shape index: {}]   ;;  %s462_s1 = inlined_call_operand.vmem [shape: s32[1,256], index: 1, kind: input, shape index: {}]   ;;  %s463_s2 = inlined_call_operand.vmem [shape: f32[3], index: 2, kind: output, shape index: {}]  }
   0x1   :  { %v344_v1 = vld [vmem:[%s461_s0] sm:$0xff]  ;;  %v349_v2 = vld [vmem:[%s461_s0 + $0x8] sm:$0xff]  ;;  %v354_v3 = vld [vmem:[%s461_s0 + $0x10] sm:$0xff] }
   0x2   :  { %v359_v4 = vld [vmem:[%s461_s0 + $0x18] sm:$0xff]  ;;  %v364_v5 = vld [vmem:[%s461_s0 + $0x20] sm:$0xff]  ;;  %v369_v6 = vld [vmem:[%s461_s0 + $0x28] sm:$0xff]  ;;  %vm371_vm0 = vcmp.lt.s32.totalorder %v16_v0, 256  ;;  %v379_v10 = vshrl.u32 %v16_v0, 7 }
   0x3   :  { %v30_v8 = vmax.f32 %v344_v1, %v364_v5  ;;  %v38_v9 = vmax.f32 %v349_v2, %v369_v6 }
   0x4   :  { %7 = vsyncpa [#allocation6], 0  ;;  %v323_v11 = vmov 0.0   ;;  %v390_v12 = vld [vmem:[%s462_s1] sm:$0x3]  ;;  %v88_v15 = vadd.s32 8, %v379_v10 }
   0x5   :  { %22 = vst.msk [vmem:[#allocation4] sm:$0x3] %vm371_vm0, %v323_v11  ;;  %20 = vst.msk [vmem:[#allocation2] sm:$0x3] %vm371_vm0, %v323_v11  ;;  %v31_v13 = vmax.f32 %v30_v8, %v354_v3  ;;  %v39_v14 = vmax.f32 %v38_v9, %v359_v4  ;;  %v396_v16 = vsub.s32 0, %v379_v10  ;;  %v399_v17 = vsub.s32 1, %v379_v10 }
   0x6   :  { %21 = vst.msk [vmem:[#allocation3] sm:$0x3] %vm371_vm0, %v323_v11  ;;  %vm126_vm1 = vcmp.ne.s32.totalorder %v390_v12, 255  ;;  %v89_v20 = vadd.s32 16, %v379_v10  ;;  %vm201_vm8 = vcmask 1040384   ;;  %s274_s24 = sshll.u32 %s463_s2, 4  ;;  %s275_s24 = int_to_ptr.vmem [resolvable:$true] %s274_s24 }
   0x7   :  { %v32_v18 = vrot.slane %v31_v13, 4  ;;  %v40_v19 = vrot.slane %v39_v14, 4  ;;  %v93_v21 = vrot.slane %v390_v12, %v396_v16  ;;  %v97_v22 = vrot.slane %v390_v12, %v399_v17  ;;  %s309_s27 = scalar_lea.vmem %s275_s24, 16  ;;  %p314_p1 = scmp.lt.s32.totalorder %s275_s24, %s275_s24 }
   0x8   :  { %v283_v25 = vsel %vm126_vm1, 1.0, %v323_v11  ;;  %p310_p0 = scmp.ne.s32.totalorder %s275_s24, %s309_s27  ;;  %p315_p2 = scmp.lt.s32.totalorder %s309_s27, %s309_s27 }
   0x9   :  { %v33_v23 = vmax.f32 %v31_v13, %v32_v18  ;;  %v41_v24 = vmax.f32 %v39_v14, %v40_v19  ;;  %vm98_vm2 = vcmp.eq.s32.totalorder %v379_v10, %v93_v21  ;;  %vm99_vm3 = vcmp.eq.s32.totalorder %v379_v10, %v97_v22 }
   0xa   :  { %vm100_vm4 = vcmp.eq.s32.totalorder %v88_v15, %v93_v21  ;;  %vm101_vm5 = vcmp.eq.s32.totalorder %v88_v15, %v97_v22  ;;  %vm102_vm6 = vcmp.eq.s32.totalorder %v89_v20, %v93_v21  ;;  %vm103_vm7 = vcmp.eq.s32.totalorder %v89_v20, %v97_v22  ;;  %p316_p3 = por %p315_p2, %p314_p1 }
   0xb   :  { %v34_v26 = vrot.slane %v33_v23, 2  ;;  %v42_v27 = vrot.slane %v41_v24, 2  ;;  %v104_v29 = vsel %vm98_vm2, %v344_v1, 0.0  ;;  %v105_v30 = vsel %vm99_vm3, %v349_v2, 0.0 }
   0xc   :  { %v181_v28 = vld [vmem:[#allocation4] sm:$0x3]  ;;  %v106_v31 = vsel %vm100_vm4, %v354_v3, 0.0  ;;  %v107_v32 = vsel %vm101_vm5, %v359_v4, 0.0  ;;  %v108_v35 = vsel %vm102_vm6, %v364_v5, 0.0  ;;  %v109_v36 = vsel %vm103_vm7, %v369_v6, 0.0  ;;  %p317_p4 = pnand %p316_p3, %p310_p0 }
   0xd   :  { %v35_v33 = vmax.f32 %v33_v23, %v34_v26  ;;  %v43_v34 = vmax.f32 %v41_v24, %v42_v27  ;;  %v110_v37 = vadd.f32 %v106_v31, %v104_v29  ;;  %v118_v38 = vadd.f32 %v107_v32, %v105_v30 }
   0xe   :  { %v184_v39 = vadd.f32 %v283_v25, %v181_v28 }
   0xf   :  { %v36_v40 = vrot.slane %v35_v33, 1  ;;  %v44_v41 = vrot.slane %v43_v34, 1  ;;  %v111_v42 = vadd.f32 %v110_v37, %v108_v35  ;;  %v119_v43 = vadd.f32 %v118_v38, %v109_v36 }
  0x10   :  { %185 = vst.msk [vmem:[#allocation4] sm:$0x3] %vm371_vm0, %v184_v39 }
  0x11   :  { %v419_v44 = vmax.f32 %v35_v33, %v36_v40  ;;  %v421_v45 = vmax.f32 %v43_v34, %v44_v41  ;;  %v112_v46 = vrot.slane %v111_v42, 4  ;;  %v120_v47 = vrot.slane %v119_v43, 4  ;;  %v155_v33 = vld [vmem:[#allocation3] sm:$0x3] }
  0x13   :  { %v46_v48 = vsub.f32 %v344_v1, %v419_v44  ;;  %v47_v49 = vsub.f32 %v349_v2, %v421_v45  ;;  %v48_v50 = vsub.f32 %v354_v3, %v419_v44  ;;  %v49_v51 = vsub.f32 %v359_v4, %v421_v45 }
  0x14   :  { %v50_v52 = vsub.f32 %v364_v5, %v419_v44  ;;  %v51_v53 = vsub.f32 %v369_v6, %v421_v45  ;;  %v113_v54 = vadd.f32 %v112_v46, %v111_v42  ;;  %v121_v55 = vadd.f32 %v120_v47, %v119_v43 }
  0x15   :  { %v52_v56 = vmul.f32 1.442695, %v46_v48  ;;  %v54_v57 = vmul.f32 1.442695, %v47_v49  ;;  %v56_v58 = vmul.f32 1.442695, %v48_v50 }
  0x16   :  { %v58_v59 = vmul.f32 1.442695, %v49_v51  ;;  %v60_v60 = vmul.f32 1.442695, %v50_v52  ;;  %v114_v61 = vrot.slane %v113_v54, 2  ;;  %v122_v62 = vrot.slane %v121_v55, 2 }
  0x17   :  { %293 = vpow2.f32 %v52_v56  ;;  %v242_v63 = vld [vmem:[#allocation4] sm:$0x3]  ;;  %v62_v0 = vmul.f32 1.442695, %v51_v53  ;;  %v324_v5 = vmov 1966171168  }
  0x18   :  { %295 = vpow2.f32 %v54_v57  ;;  %v247_v1 = vrot.slane %v242_v63, %v396_v16  ;;  %v251_v2 = vrot.slane %v242_v63, %v399_v17  ;;  %v115_v3 = vadd.f32 %v114_v61, %v113_v54 }
  0x19   :  { %297 = vpow2.f32 %v56_v58  ;;  %v123_v4 = vadd.f32 %v122_v62, %v121_v55  ;;  %v134_v6 = vunpack.c.l.s4 %v324_v5 }
  0x1a   :  { %299 = vpow2.f32 %v58_v59  ;;  %v254_v8 = vsel %vm201_vm8, %v247_v1, 0.0  ;;  %v255_v9 = vsel %vm201_vm8, %v251_v2, 0.0  ;;  %v116_v11 = vrot.slane %v115_v3, 1  ;;  %v127_v1 = vld [vmem:[#allocation2] sm:$0x3] }
  0x1b   :  { %301 = vpow2.f32 %v60_v60  ;;  %v124_v13 = vrot.slane %v123_v4, 1  ;;  %v256_v14 = vadd.f32 %v255_v9, %v254_v8  ;;  %v135_v19 = vunpack.c.0.s8 %v134_v6 }
  0x1c   :  { %303 = vpow2.f32 %v62_v0  ;;  %v117_v15 = vadd.f32 %v116_v11, %v115_v3 }
  0x1d   :  { %v125_v18 = vadd.f32 %v124_v13, %v123_v4  ;;  %257 = vadd.xlane.f32.xlu1 %v256_v14  ;;  %v138_v24 = vsub.s32 %v135_v19, %v379_v10 }
  0x1e   :  { %v156_v20 = vsub.f32 1.0, %v117_v15 }
  0x1f   :  { %v157_v21 = vsub.f32 1.0, %v125_v18 }
  0x20   :  { %v158_v22 = vmul.f32 %v156_v20, %v156_v20 }
  0x21   :  { %v159_v23 = vmul.f32 %v157_v21, %v157_v21 }
  0x23   :  { %v162_v25 = vcombine.low %v158_v22, %v159_v23 }
  0x24   :  { %v294_v26 = vpop.eup %293 }
  0x25   :  { %v296_v27 = vpop.eup %295  ;;  %v169_v28 = vrot.slane %v162_v25, %v138_v24 }
  0x26   :  { %v298_v29 = vpop.eup %297 }
  0x27   :  { %v300_v30 = vpop.eup %299  ;;  %v64_v31 = vadd.f32 %v298_v29, %v294_v26  ;;  %v176_v32 = vrot.slane %v169_v28, %v138_v24 }
  0x28   :  { %v302_v34 = vpop.eup %301  ;;  %v72_v35 = vadd.f32 %v300_v30, %v296_v27 }
  0x29   :  { %v304_v36 = vpop.eup %303  ;;  %v65_v37 = vadd.f32 %v302_v34, %v64_v31  ;;  %v178_v38 = vsel %vm126_vm1, %v176_v32, 0.0 }
  0x2a   :  { %v73_v39 = vadd.f32 %v304_v36, %v72_v35  ;;  %v179_v40 = vadd.f32 %v178_v38, %v155_v33 }
  0x2b   :  { %v66_v41 = vrot.slane %v65_v37, 4 }
  0x2c   :  { %v74_v10 = vrot.slane %v73_v39, 4  ;;  %180 = vst.msk [vmem:[#allocation3] sm:$0x3] %vm371_vm0, %v179_v40 }
  0x2d   :  { %v67_v42 = vadd.f32 %v66_v41, %v65_v37 }
  0x2e   :  { %v75_v43 = vadd.f32 %v74_v10, %v73_v39 }
  0x2f   :  { %v68_v46 = vrot.slane %v67_v42, 2 }
  0x30   :  { %v76_v47 = vrot.slane %v75_v43, 2 }
  0x31   :  { %v69_v48 = vadd.f32 %v68_v46, %v67_v42 }
  0x32   :  { %v77_v49 = vadd.f32 %v76_v47, %v75_v43 }
  0x33   :  { %v70_v50 = vrot.slane %v69_v48, 1  ;;  %v216_v4 = vld [vmem:[#allocation3] sm:$0x3] }
  0x34   :  { %v78_v51 = vrot.slane %v77_v49, 1  ;;  %v221_v5 = vrot.slane %v216_v4, %v396_v16 }
  0x35   :  { %v71_v52 = vadd.f32 %v70_v50, %v69_v48 }
  0x36   :  { %v79_v53 = vadd.f32 %v78_v51, %v77_v49  ;;  %v228_v12 = vsel %vm201_vm8, %v221_v5, 0.0 }
  0x37   :  { %305 = vlog2.f32 %v71_v52 }
  0x38   :  { %307 = vlog2.f32 %v79_v53 }
  0x44   :  { %v306_v54 = vpop.eup %305 }
  0x45   :  { %v308_v55 = vpop.eup %307  ;;  %v81_v56 = vmul.f32 0.6931472, %v306_v54 }
  0x46   :  { %v83_v57 = vmul.f32 0.6931472, %v308_v55 }
  0x47   :  { %v84_v58 = vadd.f32 %v81_v56, %v419_v44  ;;  %v225_v44 = vrot.slane %v216_v4, %v399_v17 }
  0x48   :  { %v85_v59 = vadd.f32 %v83_v57, %v421_v45 }
  0x49   :  { %v128_v60 = vsub.f32 %v84_v58, %v117_v15  ;;  %v229_v13 = vsel %vm201_vm8, %v225_v44, 0.0 }
  0x4a   :  { %v129_v61 = vsub.f32 %v85_v59, %v125_v18  ;;  %v230_v14 = vadd.f32 %v229_v13, %v228_v12 }
  0x4c   :  { %v132_v62 = vcombine.low %v128_v60, %v129_v61 }
  0x4e   :  { %v139_v63 = vrot.slane %v132_v62, %v138_v24 }
  0x50   :  { %v146_v0 = vrot.slane %v139_v63, %v138_v24 }
  0x52   :  { %v148_v2 = vsel %vm126_vm1, %v146_v0, 0.0 }
  0x53   :  { %v149_v3 = vadd.f32 %v148_v2, %v127_v1 }
  0x55   :  { %154 = vst.msk [vmem:[#allocation2] sm:$0x3] %vm371_vm0, %v149_v3 }
  0x5c   :  { %v189_v6 = vld [vmem:[#allocation2] sm:$0x3] }
  0x5d   :  { %v194_v45 = vrot.slane %v189_v6, %v396_v16  ;;  %v198_v8 = vrot.slane %v189_v6, %v399_v17 }
  0x5f   :  { %v202_v9 = vsel %vm201_vm8, %v194_v45, 0.0  ;;  %v203_v11 = vsel %vm201_vm8, %v198_v8, 0.0 }
  0x60   :  { %v204_v7 = vadd.f32 %v203_v11, %v202_v9 }
  0x62   :  { %205 = vadd.xlane.f32.xlu0 %v204_v7 }
  0x66   :  { %231 = vadd.xlane.f32.xlu0 %v230_v14 }
  0xa6   :  { %v258_v15 = vpop.xlane.xlu1 %257 }
  0xa7   :  { %v259_v18 = vrot.slane %v258_v15, 4 }
  0xa9   :  { %v260_v19 = vadd.f32 %v259_v18, %v258_v15 }
  0xab   :  { %v261_v22 = vrot.slane %v260_v19, 2 }
  0xad   :  { %v262_v27 = vadd.f32 %v261_v22, %v260_v19 }
  0xaf   :  { %v263_v32 = vrot.slane %v262_v27, 1 }
  0xb1   :  { %v264_v35 = vadd.f32 %v263_v32, %v262_v27 }
  0xeb   :  { %v206_v20 = vpop.xlane.xlu0 %205 }
  0xec   :  { %v207_v21 = vrot.slane %v206_v20, 4 }
  0xee   :  { %v208_v16 = vadd.f32 %v207_v21, %v206_v20 }
  0xef   :  { %v232_v17 = vpop.xlane.xlu0 %231 }
  0xf0   :  { %v209_v23 = vrot.slane %v208_v16, 2  ;;  %v233_v24 = vrot.slane %v232_v17, 4 }
  0xf2   :  { %v234_v25 = vadd.f32 %v233_v24, %v232_v17  ;;  %v210_v26 = vadd.f32 %v209_v23, %v208_v16 }
  0xf4   :  { %v235_v28 = vrot.slane %v234_v25, 2  ;;  %v211_v29 = vrot.slane %v210_v26, 1 }
  0xf6   :  { %v236_v30 = vadd.f32 %v235_v28, %v234_v25  ;;  %v212_v31 = vadd.f32 %v211_v29, %v210_v26 }
  0xf8   :  { %284 = vpush %v212_v31  ;;  %v237_v33 = vrot.slane %v236_v30, 1 }
  0xfa   :  { %v238_v34 = vadd.f32 %v237_v33, %v236_v30 }
  0xfc   :  { %286 = vpush %v238_v34 }
  0xfd   :  { %288 = vpush %v264_v35 }
 0x129   :  { %s285_s1 = spop %284 }
 0x12a   :  { %215 = sst [smem:[#allocation5]] %s285_s1 }
 0x12d   :  { %s287_s25 = spop %286 }
 0x12e   :  { %241 = sst [smem:[#allocation5 + $0x1]] %s287_s25  ;;  %s289_s26 = spop %288 }
 0x12f   :  { %267 = sst [smem:[#allocation5 + $0x2]] %s289_s26 }
 0x130   :  { %320 = shalt.err (!%p317_p4)
}
 0x131   :  { %s325_s28 = smov [#allocation5]  }
 0x132   :  { %277 = dma.smem_to_vmem %s325_s28, 16, %s275_s24, [#allocation6]  }
 0x133   :  { %321 = dma.done.wait [#allocation6], 16  }
 0x134   :  { %322 = vsyncadd [#allocation6], 4294967280 }
 0x135   :  { %281 = sfence }
 0x136   :  { %282 = vsyncpa [#allocation6], 1 }

// kernel: distance_optimization_loss.2
= control target key start
LH: loop header
LB: loop body
LE: loop exit
PB: predicated region body
PF: predicated region fallthrough
CT: control target
= control target key end

     0   :  { %9 = vsyncpa [#allocation6], 0  ;;  %s2520_s0 = inlined_call_operand.hbm [shape: f32[2,8,8,8], index: 0, kind: input, shape index: {}]   ;;  %s2521_s1 = inlined_call_operand.vmem [shape: f32[16,8], index: 1, kind: input, shape index: {}]   ;;  %s2522_s2 = inlined_call_operand.vmem [shape: f32[8,16], index: 2, kind: input, shape index: {}]   ;;  %s2523_s3 = inlined_call_operand.vmem [shape: s32[2,16,16], index: 3, kind: input, shape index: {}]   ;;  %s2524_s4 = inlined_call_operand.vmem [shape: f32[2,8,128], index: 4, kind: output, shape index: {}]  }
   0x1   :  { %11 = vsyncpa [#allocation6 + $0x1], 0  ;;  %s2192_s15 = smov 0   ;;  %s2194_s16 = smov 0  }
   0x2   :  { %s2196_s17 = smov 0   ;;  %s2198_s18 = smov 0  }
   0x3   :  { %s2200_s19 = smov 0   ;;  %s2202_s20 = smov 0  }
   0x4 LB: > { %s1820_s21 = sadd.s32 4294967295, %s2160_s20   ;;  %s29_s22 = sadd.s32 1, %s2156_s19  ;;  %s2160_s20 = sphi %s2202_s20, %s17_s20   ;;  %s2156_s19 = sphi %s2200_s19, %s2532_s19   ;;  %s2152_s18 = sphi %s2198_s18, %s2531_s18   ;;  %s2148_s17 = sphi %s2196_s17, %s2530_s17   ;;  %s2144_s16 = sphi %s2194_s16, %s2529_s16   ;;  %s2140_s15 = sphi %s2192_s15, %s2528_s15  }
   0x5   : > { %p31_p0 = scmp.ge.s32.totalorder %s29_s22, 2  ;;  %s36_s23 = sadd.s32 1, %s2148_s17 }
   0x6   : > { %p43_p1 = scmp.ne.s32.totalorder %s2148_s17, %s2144_s16  ;;  %p44_p2 = scmp.eq.s32.totalorder %s2160_s20, 0 }
   0x7   : > { %s2534_s22 = smov (%p31_p0, %s29_s22), 0  ;;  %p49_p4 = scmp.ne.s32.totalorder %s2144_s16, %s2140_s15 }
   0x8   : > { %p2228_p3 = por %p44_p2, %p43_p1  ;;  %s33_s25 = ssub.s32 %s2156_s19, %s2534_s22 }
   0x9   : > { %p50_p5 = scmp.eq.s32.totalorder %s1820_s21, 0  ;;  %p34_p6 = scmp.eq.s32.totalorder %s33_s25, 0 }
   0xa   : > { %p1993_p8 = scmp.lt.s32.totalorder %s2160_s20, 2  ;;  %s186_s28 = sand.u32 1, %s2148_s17  }
   0xb   : > { %p2235_p7 = por %p50_p5, %p49_p4  ;;  %s1861_s29 = sshll.u32 %s2156_s19, 10 }
   0xc   : > { %s2241_s27 = scalar_select %p34_p6, %s2148_s17, %s36_s23  }
   0xd   : > { %s1825_s30 = sshll.u32 %s186_s28, 6  ;;  %s196_s7 = scalar_lea.hbm %s2520_s0, %s1861_s29 }
   0xe   : > { %s190_s8 = scalar_lea.vmem [#allocation5], %s1825_s30  ;;  %p2250_p9 = pnand %p1993_p8, %p2228_p3 }
   0xf   : > { %s197_s9 = sshll.u32 %s190_s8, 4  ;;  %s187_s11 = scalar_lea.sflag [#allocation6], %s186_s28  ;;  %s198_s9 = int_to_ptr.vmem [resolvable:$true] %s197_s9 }
  0x10   : > { %p2084_p10 = pneg %p2250_p9  ;;  %s2095_s12 = scalar_lea.vmem %s198_s9, 1024 }
  0x11   : > { %p2096_p11 = scmp.ne.s32.totalorder %s198_s9, %s2095_s12  ;;  %s2162_s13 = smov [#allocation5]  }
  0x12   : > { %s2100_s14 = sshll.u32 %s2162_s13, 4  ;;  %s2101_s14 = int_to_ptr.vmem [resolvable:$false] %s2100_s14 }
  0x13   : > { %p2098_p12 = pnand %p2096_p11, %p2084_p10  ;;  %s2102_s15 = scalar_lea.vmem %s2101_s14, 2048 }
  0x14   : > { %p2103_p0 = scmp.lt.s32.totalorder %s198_s9, %s2101_s14  ;;  %p2104_p1 = scmp.lt.s32.totalorder %s2102_s15, %s2095_s12 }
  0x15   : > { %p2099_p13 = pneg %p2098_p12 }
  0x16   : > { %p2105_p2 = por %p2104_p1, %p2103_p0 }
  0x18   : > { %p2106_p3 = pnand %p2105_p2, %p2099_p13 }
  0x1a   : > { %2109 = shalt.err (!%p2106_p3)
}
  0x1b   : > { %s2163_s21 = smov 128   ;;  %s2164_s23 = smov 8  }
  0x1c   : > { %1992 = dma.hbm_to_vmem [thread:$0]  (!%p2250_p9), %s196_s7, 1024, %s198_s9, %s187_s11, %s2163_s21, %s2163_s21, %s2164_s23  }
  0x1d   : > { %p1828_p4 = scmp.ge.s32.totalorder %s2160_s20, 1  ;;  %p218_p5 = scmp.lt.s32.totalorder %s2160_s20, 3 }
  0x1f   : > { %p219_p6 = pnand %p1828_p4, %p218_p5 }
  0x20   : > { %s224_s24 = sand.u32 (!%p219_p6), 1, %s2144_s16  }
  0x21   : > { %222 = sbr.rel (%p219_p6) target bundleno = 735 (0x2df), region = 36  ;;  %s1829_s25 = sshll.u32 (!%p219_p6), %s224_s24, 6 }
  0x22   : > { %s225_s28 = scalar_lea.sflag (!%p219_p6), [#allocation6], %s224_s24  ;;  %s2261_s29 = scalar_lea.vmem (!%p219_p6), [#allocation5], %s1829_s25 }
  0x26   : > { %2135 = dma.done.wait (%p2235_p7), %s225_s28, 1024  }
  0x27   : > { %2137 = vsyncadd (%p2235_p7), %s225_s28, 4294966272  ;;  %v2165_v0 = vmov 0.0   ;;  %vm2166_vm0 = vmmov 0   ;;  %vm299_vm1 = vcmask 64512   ;;  %v298_v1 = vld [vmem:[%s2522_s2] sm:$0xff]  ;;  %v291_v3 = vld [vmem:[%s2261_s29 + $0x8] sm:$0xff] }
  0x28   : > { %1903 = vmatprep.subr.mxu0 %v2165_v0  ;;  %1908 = vmatprep.subr.mxu1 %v2165_v0  ;;  %v290_v2 = vld [vmem:[%s2261_s29] sm:$0xff]  ;;  %v292_v4 = vld [vmem:[%s2261_s29 + $0x10] sm:$0xff]  ;;  %v293_v5 = vld [vmem:[%s2261_s29 + $0x18] sm:$0xff]  ;;  %vm373_vm2 = vcmask 130048   ;;  %p273_p7 = scmp.lt.s32.totalorder %s2152_s18, 1 }
  0x29   : > { %1905 = vmatprep.mubr.msk.f32.mxu0 %vm2166_vm0, %v2165_v0  ;;  %1910 = vmatprep.mubr.msk.f32.mxu1 %vm2166_vm0, %v2165_v0  ;;  %v294_v6 = vld [vmem:[%s2261_s29 + $0x20] sm:$0xff]  ;;  %v295_v7 = vld [vmem:[%s2261_s29 + $0x28] sm:$0xff]  ;;  %v296_v8 = vld [vmem:[%s2261_s29 + $0x30] sm:$0xff]  ;;  %900 = vst.msk [vmem:[#allocation3] sm:$0xff] %vm373_vm2, %v2165_v0 }
  0x2a   : > { %1904 = vmatpush3.msra.mxu0 %v298_v1  ;;  %1909 = vmatpush3.msra.mxu1 %v298_v1  ;;  %v297_v9 = vld [vmem:[%s2261_s29 + $0x38] sm:$0xff]  ;;  %901 = vst.msk [vmem:[#allocation3 + $0x8] sm:$0xff] %vm373_vm2, %v2165_v0  ;;  %902 = vst.msk [vmem:[#allocation4] sm:$0xff] %vm373_vm2, %v2165_v0  ;;  %v904_v10 = vld [vmem:[%s2521_s1] sm:$0xff]  ;;  %s2536_s18 = smov (!%p273_p7, %s2152_s18), 1 }
  0x2b   : > { %1906 = vmatmul.mubr.msk.f32.vlgmr.msra.gmra.mxu0 %vm299_vm1, %v290_v2  ;;  %1911 = vmatmul.mubr.msk.f32.vlgmr.msra.gmra.mxu1 %vm299_vm1, %v291_v3  ;;  %903 = vst.msk [vmem:[#allocation4 + $0x8] sm:$0xff] %vm373_vm2, %v2165_v0  ;;  %v905_v23 = vld [vmem:[%s2521_s1 + $0x8] sm:$0xff]  ;;  %s1862_s9 = sshll.u32 %s2536_s18, 4  ;;  %s1832_s13 = sshll.u32 %s2536_s18, 3 }
  0x2c   : > { %1913 = vmatprep.subr.mxu0 %v2165_v0  ;;  %1918 = vmatprep.subr.mxu1 %v2165_v0  ;;  %s280_s12 = scalar_lea.vmem %s2523_s3, %s1862_s9  ;;  %s285_s23 = scalar_lea.vmem %s2524_s4, %s1832_s13 }
  0x2d   : > { %1914 = vmatpush3.msra.mxu0 %v298_v1  ;;  %1915 = vmatprep.mubr.msk.f32.mxu0 %vm2166_vm0, %v2165_v0  ;;  %v2356_v36 = vld [vmem:[%s280_s12 + $0x8] sm:$0xff]  ;;  %v2363_v40 = vld [vmem:[%s280_s12] sm:$0xff] }
  0x2e   : > { %1919 = vmatpush3.msra.mxu1 %v298_v1  ;;  %1920 = vmatprep.mubr.msk.f32.mxu1 %vm2166_vm0, %v2165_v0  ;;  %vm1654_vm3 = vcmp.ne.s32.totalorder %v2356_v36, 255  ;;  %vm1653_vm4 = vcmp.ne.s32.totalorder %v2363_v40, 255  ;;  %vm1606_vm5 = vcmp.eq.s32.totalorder %v2356_v36, 0  ;;  %vm1612_vm6 = vcmp.eq.s32.totalorder %v2356_v36, 1 }
  0x2f   : > { %1916 = vmatmul.mubr.msk.f32.vlgmr.msra.gmra.mxu0 %vm299_vm1, %v292_v4  ;;  %1921 = vmatmul.mubr.msk.f32.vlgmr.msra.gmra.mxu1 %vm299_vm1, %v293_v5  ;;  %v1858_v38 = vsel %vm1654_vm3, 1.0, %v2165_v0  ;;  %v1857_v42 = vsel %vm1653_vm4, 1.0, %v2165_v0  ;;  %vm1618_vm7 = vcmp.eq.s32.totalorder %v2356_v36, 2  ;;  %vm1624_vm8 = vcmp.eq.s32.totalorder %v2356_v36, 3 }
  0x30   : > { %1923 = vmatprep.subr.mxu0 %v2165_v0  ;;  %1928 = vmatprep.subr.mxu1 %v2165_v0  ;;  %vm1605_vm9 = vcmp.eq.s32.totalorder %v2363_v40, 0  ;;  %vm1611_vm10 = vcmp.eq.s32.totalorder %v2363_v40, 1  ;;  %vm1617_vm11 = vcmp.eq.s32.totalorder %v2363_v40, 2  ;;  %vm1630_vm12 = vcmp.eq.s32.totalorder %v2356_v36, 4 }
  0x31   : > { %1924 = vmatpush3.msra.mxu0 %v298_v1  ;;  %1925 = vmatprep.mubr.msk.f32.mxu0 %vm2166_vm0, %v2165_v0  ;;  %v1666_v41 = vld [vmem:[#allocation4] sm:$0xff]  ;;  %vm1636_vm13 = vcmp.eq.s32.totalorder %v2356_v36, 5  ;;  %vm1623_vm14 = vcmp.eq.s32.totalorder %v2363_v40, 3  ;;  %vm1629_vm15 = vcmp.eq.s32.totalorder %v2363_v40, 4 }
  0x32   : > { %1929 = vmatpush3.msra.mxu1 %v298_v1  ;;  %1930 = vmatprep.mubr.msk.f32.mxu1 %vm2166_vm0, %v2165_v0  ;;  %v1667_v37 = vld [vmem:[#allocation4 + $0x8] sm:$0xff]  ;;  %v1672_v43 = vadd.f32 %v1857_v42, %v1666_v41 }
  0x33   : > { %1926 = vmatmul.mubr.msk.f32.vlgmr.msra.gmra.mxu0 %vm299_vm1, %v294_v6  ;;  %1931 = vmatmul.mubr.msk.f32.vlgmr.msra.gmra.mxu1 %vm299_vm1, %v295_v7  ;;  %v1673_v39 = vadd.f32 %v1858_v38, %v1667_v37 }
  0x34   : > { %1933 = vmatprep.subr.mxu0 %v2165_v0  ;;  %1938 = vmatprep.subr.mxu1 %v2165_v0  ;;  %1674 = vst.msk [vmem:[#allocation4] sm:$0xff] %vm373_vm2, %v1672_v43 }
  0x35   : > { %1934 = vmatpush3.msra.mxu0 %v298_v1  ;;  %1935 = vmatprep.mubr.msk.f32.mxu0 %vm2166_vm0, %v2165_v0  ;;  %1675 = vst.msk [vmem:[#allocation4 + $0x8] sm:$0xff] %vm373_vm2, %v1673_v39 }
  0x36   : > { %1939 = vmatpush3.msra.mxu1 %v298_v1  ;;  %1940 = vmatprep.mubr.msk.f32.mxu1 %vm2166_vm0, %v2165_v0  ;;  %vm1642_vm0 = vcmp.eq.s32.totalorder %v2356_v36, 6 }
  0x37   : > { %1936 = vmatmul.mubr.msk.f32.vlgmr.msra.gmra.mxu0 %vm299_vm1, %v296_v8  ;;  %1941 = vmatmul.mubr.msk.f32.vlgmr.msra.gmra.mxu1 %vm299_vm1, %v297_v9 }
  0x38   : > { %1945 = vmatprep.mubr.msk.f32.mxu0 %vm299_vm1, %v904_v10  ;;  %1950 = vmatprep.mubr.msk.f32.mxu1 %vm299_vm1, %v904_v10 }
  0xeb   : > { %v369_v11 = vpop.f32.mrf.mxu0  ;;  %v444_v12 = vpop.f32.mrf.mxu1 }
  0xec   : > { %374 = vst.msk [vmem:[#allocation2] sm:$0xff] %vm373_vm2, %v369_v11  ;;  %449 = vst.msk [vmem:[#allocation2 + $0x8] sm:$0xff] %vm373_vm2, %v444_v12 }
  0xed   : > { %v1907_v13 = vpop.f32.mrf.mxu0  ;;  %v1912_v14 = vpop.f32.mrf.mxu1 }
  0xef   : > { %v519_v15 = vpop.f32.mrf.mxu0  ;;  %v594_v16 = vpop.f32.mrf.mxu1 }
  0xf0   : > { %524 = vst.msk [vmem:[#allocation2 + $0x10] sm:$0xff] %vm373_vm2, %v519_v15  ;;  %599 = vst.msk [vmem:[#allocation2 + $0x18] sm:$0xff] %vm373_vm2, %v594_v16 }
  0xf1   : > { %v1917_v17 = vpop.f32.mrf.mxu0  ;;  %v1922_v18 = vpop.f32.mrf.mxu1 }
  0xf3   : > { %v669_v19 = vpop.f32.mrf.mxu0  ;;  %v744_v20 = vpop.f32.mrf.mxu1  ;;  %v906_v21 = vld [vmem:[#allocation2] sm:$0xff]  ;;  %v907_v22 = vld [vmem:[#allocation2 + $0x8] sm:$0xff] }
  0xf4   : > { %674 = vst.msk [vmem:[#allocation2 + $0x20] sm:$0xff] %vm373_vm2, %v669_v19  ;;  %749 = vst.msk [vmem:[#allocation2 + $0x28] sm:$0xff] %vm373_vm2, %v744_v20  ;;  %1943 = vmatprep.subr.mxu0 %v906_v21  ;;  %1948 = vmatprep.subr.mxu1 %v907_v22 }
  0xf5   : > { %v1927_v24 = vpop.f32.mrf.mxu0  ;;  %v1932_v25 = vpop.f32.mrf.mxu1  ;;  %1944 = vmatpush3.msra.mxu0 %v906_v21  ;;  %1949 = vmatpush3.msra.mxu1 %v907_v22 }
  0xf6   : > { %1946 = vmatmul.mubr.msk.f32.vlgmr.msra.gmra.mxu0 %vm299_vm1, %v905_v23  ;;  %1951 = vmatmul.mubr.msk.f32.vlgmr.msra.gmra.mxu1 %vm299_vm1, %v905_v23 }
  0xf7   : > { %v819_v26 = vpop.f32.mrf.mxu0  ;;  %v894_v27 = vpop.f32.mrf.mxu1  ;;  %v908_v28 = vld [vmem:[#allocation2 + $0x10] sm:$0xff]  ;;  %1955 = vmatprep.mubr.msk.f32.mxu0 %vm299_vm1, %v904_v10  ;;  %v909_v29 = vld [vmem:[#allocation2 + $0x18] sm:$0xff]  ;;  %1960 = vmatprep.mubr.msk.f32.mxu1 %vm299_vm1, %v904_v10 }
  0xf8   : > { %824 = vst.msk [vmem:[#allocation2 + $0x30] sm:$0xff] %vm373_vm2, %v819_v26  ;;  %899 = vst.msk [vmem:[#allocation2 + $0x38] sm:$0xff] %vm373_vm2, %v894_v27  ;;  %1953 = vmatprep.subr.mxu0 %v908_v28  ;;  %1958 = vmatprep.subr.mxu1 %v909_v29 }
  0xf9   : > { %v1937_v30 = vpop.f32.mrf.mxu0  ;;  %v1942_v31 = vpop.f32.mrf.mxu1  ;;  %1954 = vmatpush3.msra.mxu0 %v908_v28  ;;  %1959 = vmatpush3.msra.mxu1 %v909_v29 }
  0xfa   : > { %1956 = vmatmul.mubr.msk.f32.vlgmr.msra.gmra.mxu0 %vm299_vm1, %v905_v23  ;;  %1961 = vmatmul.mubr.msk.f32.vlgmr.msra.gmra.mxu1 %vm299_vm1, %v905_v23 }
  0xfb   : > { %v910_v32 = vld [vmem:[#allocation2 + $0x20] sm:$0xff]  ;;  %1965 = vmatprep.mubr.msk.f32.mxu0 %vm299_vm1, %v904_v10  ;;  %v911_v33 = vld [vmem:[#allocation2 + $0x28] sm:$0xff]  ;;  %1970 = vmatprep.mubr.msk.f32.mxu1 %vm299_vm1, %v904_v10 }
  0xfc   : > { %1963 = vmatprep.subr.mxu0 %v910_v32  ;;  %1968 = vmatprep.subr.mxu1 %v911_v33 }
  0xfd   : > { %1964 = vmatpush3.msra.mxu0 %v910_v32  ;;  %1969 = vmatpush3.msra.mxu1 %v911_v33 }
  0xfe   : > { %1966 = vmatmul.mubr.msk.f32.vlgmr.msra.gmra.mxu0 %vm299_vm1, %v905_v23  ;;  %1971 = vmatmul.mubr.msk.f32.vlgmr.msra.gmra.mxu1 %vm299_vm1, %v905_v23 }
  0xff   : > { %v912_v34 = vld [vmem:[#allocation2 + $0x30] sm:$0xff]  ;;  %1975 = vmatprep.mubr.msk.f32.mxu0 %vm299_vm1, %v904_v10  ;;  %v913_v35 = vld [vmem:[#allocation2 + $0x38] sm:$0xff]  ;;  %1980 = vmatprep.mubr.msk.f32.mxu1 %vm299_vm1, %v904_v10 }
 0x100   : > { %1973 = vmatprep.subr.mxu0 %v912_v34  ;;  %1978 = vmatprep.subr.mxu1 %v913_v35 }
 0x101   : > { %1974 = vmatpush3.msra.mxu0 %v912_v34  ;;  %1979 = vmatpush3.msra.mxu1 %v913_v35 }
 0x102   : > { %1976 = vmatmul.mubr.msk.f32.vlgmr.msra.gmra.mxu0 %vm299_vm1, %v905_v23  ;;  %1981 = vmatmul.mubr.msk.f32.vlgmr.msra.gmra.mxu1 %vm299_vm1, %v905_v23  ;;  %vm1648_vm1 = vcmp.eq.s32.totalorder %v2356_v36, 7 }
 0x1b6   : > { %v2370_v44 = vpop.f32.mrf.mxu0  ;;  %v2372_v45 = vpop.f32.mrf.mxu1 }
 0x1b7   : > { %v1524_v48 = vmax.f32 %v2370_v44, %v2372_v45 }
 0x1b8   : > { %v2374_v46 = vpop.f32.mrf.mxu0  ;;  %v2376_v47 = vpop.f32.mrf.mxu1 }
 0x1b9   : > { %v1523_v51 = vmax.f32 %v2374_v46, %v2376_v47 }
 0x1ba   : > { %v2380_v49 = vpop.f32.mrf.mxu0  ;;  %v2382_v50 = vpop.f32.mrf.mxu1 }
 0x1bb   : > { %v1526_v52 = vmax.f32 %v1524_v48, %v2380_v49 }
 0x1bc   : > { %v2387_v53 = vpop.f32.mrf.mxu0  ;;  %v2389_v54 = vpop.f32.mrf.mxu1 }
 0x1bd   : > { %v1525_v55 = vmax.f32 %v1523_v51, %v2387_v53  ;;  %v1528_v56 = vmax.f32 %v1526_v52, %v2382_v50 }
 0x1be   : > { %v2393_v57 = vpop.f32.mrf.mxu0  ;;  %v2395_v58 = vpop.f32.mrf.mxu1 }
 0x1bf   : > { %v1527_v59 = vmax.f32 %v1525_v55, %v2389_v54  ;;  %v1530_v60 = vmax.f32 %v1528_v56, %v2393_v57 }
 0x1c0   : > { %v2399_v61 = vpop.f32.mrf.mxu0  ;;  %v2401_v62 = vpop.f32.mrf.mxu1 }
 0x1c1   : > { %v1529_v63 = vmax.f32 %v1527_v59, %v2399_v61  ;;  %v1532_v0 = vmax.f32 %v1530_v60, %v2395_v58 }
 0x1c2   : > { %v2405_v1 = vpop.f32.mrf.mxu0  ;;  %v2411_v5 = vpop.f32.mrf.mxu1 }
 0x1c3   : > { %v1531_v2 = vmax.f32 %v1529_v63, %v2401_v62  ;;  %v1534_v3 = vmax.f32 %v1532_v0, %v2405_v1 }
 0x1c4   : > { %v2409_v4 = vpop.f32.mrf.mxu0  ;;  %v2425_v12 = vpop.f32.mrf.mxu1 }
 0x1c5   : > { %v1533_v6 = vmax.f32 %v1531_v2, %v2409_v4  ;;  %v2415_v7 = vmax.f32 %v1534_v3, %v2411_v5  ;;  %v1608_v2 = vsel %vm1606_vm5, %v2370_v44, 0.0  ;;  %v1614_v3 = vsel %vm1612_vm6, %v2372_v45, 0.0 }
 0x1c6   : > { %vm1635_vm5 = vcmp.eq.s32.totalorder %v2363_v40, 5  ;;  %vm1641_vm6 = vcmp.eq.s32.totalorder %v2363_v40, 6 }
 0x1c7   : > { %v1538_v8 = vsub.f32 %v2370_v44, %v2415_v7  ;;  %v1544_v9 = vsub.f32 %v2372_v45, %v2415_v7  ;;  %v1552_v10 = vsub.f32 %v2380_v49, %v2415_v7  ;;  %v1560_v11 = vsub.f32 %v2382_v50, %v2415_v7 }
 0x1c8   : > { %v1568_v15 = vsub.f32 %v2393_v57, %v2415_v7  ;;  %v2430_v16 = vmax.f32 %v1533_v6, %v2425_v12  ;;  %v1576_v18 = vsub.f32 %v2395_v58, %v2415_v7  ;;  %v1584_v23 = vsub.f32 %v2405_v1, %v2415_v7 }
 0x1c9   : > { %v1541_v13 = vmul.f32 1.442695, %v1538_v8  ;;  %v1547_v14 = vmul.f32 1.442695, %v1544_v9  ;;  %v1555_v17 = vmul.f32 1.442695, %v1552_v10  ;;  %v1592_v26 = vsub.f32 %v2411_v5, %v2415_v7 }
 0x1ca   : > { %v1537_v19 = vsub.f32 %v2374_v46, %v2430_v16  ;;  %v1563_v20 = vmul.f32 1.442695, %v1560_v11  ;;  %v1543_v21 = vsub.f32 %v2376_v47, %v2430_v16  ;;  %v1571_v22 = vmul.f32 1.442695, %v1568_v15 }
 0x1cb   : > { %2046 = vpow2.f32 %v1541_v13  ;;  %v1579_v24 = vmul.f32 1.442695, %v1576_v18  ;;  %v1551_v25 = vsub.f32 %v2387_v53, %v2430_v16  ;;  %v1559_v29 = vsub.f32 %v2389_v54, %v2430_v16 }
 0x1cc   : > { %2048 = vpow2.f32 %v1547_v14  ;;  %v1539_v27 = vmul.f32 1.442695, %v1537_v19  ;;  %v1545_v28 = vmul.f32 1.442695, %v1543_v21  ;;  %v1587_v30 = vmul.f32 1.442695, %v1584_v23 }
 0x1cd   : > { %2050 = vpow2.f32 %v1555_v17  ;;  %v1553_v31 = vmul.f32 1.442695, %v1551_v25  ;;  %v1567_v32 = vsub.f32 %v2399_v61, %v2430_v16  ;;  %v1595_v33 = vmul.f32 1.442695, %v1592_v26 }
 0x1ce   : > { %2052 = vpow2.f32 %v1563_v20  ;;  %v1561_v34 = vmul.f32 1.442695, %v1559_v29  ;;  %v1575_v35 = vsub.f32 %v2401_v62, %v2430_v16  ;;  %v1583_v38 = vsub.f32 %v2409_v4, %v2430_v16 }
 0x1cf   : > { %2054 = vpow2.f32 %v1571_v22  ;;  %v1569_v37 = vmul.f32 1.442695, %v1567_v32  ;;  %v1591_v42 = vsub.f32 %v2425_v12, %v2430_v16  ;;  %v1620_v10 = vsel %vm1618_vm7, %v2380_v49, 0.0 }
 0x1d0   : > { %2056 = vpow2.f32 %v1579_v24  ;;  %v1577_v41 = vmul.f32 1.442695, %v1575_v35  ;;  %v1585_v51 = vmul.f32 1.442695, %v1583_v38  ;;  %v1616_v13 = vadd.f32 %v1614_v3, %v1608_v2 }
 0x1d1   : > { %2058 = vpow2.f32 %v1539_v27  ;;  %v1593_v56 = vmul.f32 1.442695, %v1591_v42  ;;  %v1626_v21 = vsel %vm1624_vm8, %v2382_v50, 0.0  ;;  %v1607_v24 = vsel %vm1605_vm9, %v2374_v46, 0.0 }
 0x1d2   : > { %2060 = vpow2.f32 %v1545_v28  ;;  %v1622_v44 = vadd.f32 %v1620_v10, %v1616_v13  ;;  %v1613_v25 = vsel %vm1611_vm10, %v2376_v47, 0.0  ;;  %v1619_v29 = vsel %vm1617_vm11, %v2387_v53, 0.0  ;;  %v1693_v10 = vld [vmem:[#allocation4] sm:$0xff] }
 0x1d3   : > { %2062 = vpow2.f32 %v1587_v30  ;;  %v1632_v30 = vsel %vm1630_vm12, %v2393_v57, 0.0  ;;  %v1615_v50 = vadd.f32 %v1613_v25, %v1607_v24  ;;  %v1638_v47 = vsel %vm1636_vm13, %v2395_v58, 0.0 }
 0x1d4   : > { %2064 = vpow2.f32 %v1553_v31  ;;  %v1628_v26 = vadd.f32 %v1626_v21, %v1622_v44  ;;  %v1625_v57 = vsel %vm1623_vm14, %v2389_v54, 0.0  ;;  %v1637_v54 = vsel %vm1635_vm5, %v2401_v62, 0.0 }
 0x1d5   : > { %2066 = vpow2.f32 %v1595_v33  ;;  %v1621_v33 = vadd.f32 %v1619_v29, %v1615_v50  ;;  %vm1647_vm7 = vcmp.eq.s32.totalorder %v2363_v40, 7  ;;  %v1707_v29 = vlaneseq }
 0x1d6   : > { %2068 = vpow2.f32 %v1561_v34  ;;  %v1634_v34 = vadd.f32 %v1632_v30, %v1628_v26  ;;  %v1649_v62 = vsel %vm1647_vm7, %v2425_v12, 0.0  ;;  %v1695_v12 = vsel %vm373_vm2, %v1693_v10, 0.0 }
 0x1d7   : > { %2070 = vpow2.f32 %v1569_v37  ;;  %v1627_v37 = vadd.f32 %v1625_v57, %v1621_v33  ;;  %v1708_v30 = vshrl.u32 %v1707_v29, 7 }
 0x1d8   : > { %v2047_v39 = vpop.eup %2046  ;;  %2072 = vpow2.f32 %v1577_v41  ;;  %v1640_v38 = vadd.f32 %v1638_v47, %v1634_v34  ;;  %v1644_v41 = vsel %vm1642_vm0, %v2405_v1, 0.0  ;;  %v1643_v1 = vsel %vm1641_vm6, %v2409_v4, 0.0 }
 0x1d9   : > { %v2049_v43 = vpop.eup %2048  ;;  %2074 = vpow2.f32 %v1585_v51 }
 0x1da   : > { %v1550_v48 = vadd.f32 %v2049_v43, %v2047_v39  ;;  %v2051_v52 = vpop.eup %2050  ;;  %2076 = vpow2.f32 %v1593_v56  ;;  %v1631_v39 = vsel %vm1629_vm15, %v2399_v61, 0.0  ;;  %v1646_v58 = vadd.f32 %v1644_v41, %v1640_v38  ;;  %v1656_v56 = vld [vmem:[#allocation3 + $0x8] sm:$0xff] }
 0x1db   : > { %v2053_v59 = vpop.eup %2052  ;;  %v1633_v42 = vadd.f32 %v1631_v39, %v1627_v37 }
 0x1dc   : > { %v1558_v55 = vadd.f32 %v2051_v52, %v1550_v48  ;;  %v2055_v60 = vpop.eup %2054  ;;  %v1650_v48 = vsel %vm1648_vm1, %v2411_v5, 0.0 }
 0x1dd   : > { %v2057_v0 = vpop.eup %2056  ;;  %v1639_v52 = vadd.f32 %v1637_v54, %v1633_v42  ;;  %v1652_v61 = vadd.f32 %v1650_v48, %v1646_v58 }
 0x1de   : > { %v1566_v63 = vadd.f32 %v2053_v59, %v1558_v55  ;;  %v2059_v6 = vpop.eup %2058 }
 0x1df   : > { %v2061_v9 = vpop.eup %2060 }
 0x1e0   : > { %v1574_v8 = vadd.f32 %v2055_v60, %v1566_v63  ;;  %v2063_v11 = vpop.eup %2062  ;;  %v1549_v15 = vadd.f32 %v2061_v9, %v2059_v6  ;;  %v1645_v60 = vadd.f32 %v1643_v1, %v1639_v52  ;;  %v1655_v6 = vld [vmem:[#allocation3] sm:$0xff] }
 0x1e1   : > { %v2065_v17 = vpop.eup %2064 }
 0x1e2   : > { %v1582_v14 = vadd.f32 %v2057_v0, %v1574_v8  ;;  %v2067_v18 = vpop.eup %2066  ;;  %v1557_v19 = vadd.f32 %v2065_v17, %v1549_v15  ;;  %v1651_v3 = vadd.f32 %v1649_v62, %v1645_v60 }
 0x1e3   : > { %v2069_v20 = vpop.eup %2068 }
 0x1e4   : > { %v1590_v45 = vadd.f32 %v2063_v11, %v1582_v14  ;;  %v1565_v22 = vadd.f32 %v2069_v20, %v1557_v19  ;;  %v2071_v23 = vpop.eup %2070  ;;  %v1694_v11 = vld [vmem:[#allocation4 + $0x8] sm:$0xff] }
 0x1e5   : > { %v2073_v28 = vpop.eup %2072 }
 0x1e6   : > { %v1598_v49 = vadd.f32 %v2067_v18, %v1590_v45  ;;  %v1573_v27 = vadd.f32 %v2071_v23, %v1565_v22  ;;  %v2075_v32 = vpop.eup %2074 }
 0x1e7   : > { %v2077_v35 = vpop.eup %2076 }
 0x1e8   : > { %2078 = vlog2.f32 %v1598_v49  ;;  %v1581_v31 = vadd.f32 %v2073_v28, %v1573_v27 }
 0x1ea   : > { %v1589_v46 = vadd.f32 %v2075_v32, %v1581_v31 }
 0x1ec   : > { %v1597_v53 = vadd.f32 %v2077_v35, %v1589_v46 }
 0x1ee   : > { %2080 = vlog2.f32 %v1597_v53 }
 0x1f5   : > { %v2079_v43 = vpop.eup %2078 }
 0x1f6   : > { %v1602_v51 = vmul.f32 0.6931472, %v2079_v43 }
 0x1f8   : > { %v1604_v55 = vadd.f32 %v1602_v51, %v2415_v7 }
 0x1fa   : > { %v1658_v59 = vsub.f32 %v1604_v55, %v1652_v61 }
 0x1fb   : > { %v2081_v5 = vpop.eup %2080 }
 0x1fc   : > { %v1660_v63 = vsel %vm1654_vm3, %v1658_v59, 0.0  ;;  %v1600_v2 = vmul.f32 0.6931472, %v2081_v5 }
 0x1fd   : > { %v1662_v0 = vadd.f32 %v1660_v63, %v1656_v56 }
 0x1fe   : > { %v1603_v7 = vadd.f32 %v1600_v2, %v2430_v16  ;;  %v1696_v16 = vsel %vm373_vm2, %v1694_v11, 0.0 }
 0x1ff   : > { %1665 = vst.msk [vmem:[#allocation3 + $0x8] sm:$0xff] %vm373_vm2, %v1662_v0  ;;  %v1697_v18 = vadd.f32 %v1696_v16, %v1695_v12 }
 0x200   : > { %v1657_v4 = vsub.f32 %v1603_v7, %v1651_v3 }
 0x202   : > { %v1659_v8 = vsel %vm1653_vm4, %v1657_v4, 0.0 }
 0x203   : > { %v1661_v9 = vadd.f32 %v1659_v8, %v1655_v6 }
 0x205   : > { %1664 = vst.msk [vmem:[#allocation3] sm:$0xff] %vm373_vm2, %v1661_v9 }
 0x206   : > { %v1680_v36 = vld [vmem:[#allocation3 + $0x8] sm:$0xff] }
 0x207   : > { %v1682_v15 = vsel %vm373_vm2, %v1680_v36, 0.0 }
 0x20c   : > { %v1679_v13 = vld [vmem:[#allocation3] sm:$0xff] }
 0x20d   : > { %v1681_v14 = vsel %vm373_vm2, %v1679_v13, 0.0  ;;  %vm1709_vm2 = vcmp.eq.s32.totalorder %v1708_v30, 0 }
 0x20e   : > { %v1683_v17 = vadd.f32 %v1682_v15, %v1681_v14 }
 0x210   : > { %1684 = vadd.xlane.f32.xlu0 %v1683_v17 }
 0x214   : > { %1698 = vadd.xlane.f32.xlu0 %v1697_v18 }
 0x299   : > { %v1685_v40 = vpop.xlane.xlu0 %1684 }
 0x29a   : > { %v1686_v44 = vrot.slane %v1685_v40, 4 }
 0x29c   : > { %v1687_v45 = vadd.f32 %v1686_v44, %v1685_v40 }
 0x29d   : > { %v1699_v19 = vpop.xlane.xlu0 %1698 }
 0x29e   : > { %v1688_v20 = vrot.slane %v1687_v45, 2  ;;  %v1700_v21 = vrot.slane %v1699_v19, 4 }
 0x2a0   : > { %v1701_v49 = vadd.f32 %v1700_v21, %v1699_v19  ;;  %v1689_v22 = vadd.f32 %v1688_v20, %v1687_v45 }
 0x2a2   : > { %v1702_v23 = vrot.slane %v1701_v49, 2  ;;  %v1690_v24 = vrot.slane %v1689_v22, 1 }
 0x2a4   : > { %v1703_v25 = vadd.f32 %v1702_v23, %v1701_v49  ;;  %v1691_v26 = vadd.f32 %v1690_v24, %v1689_v22 }
 0x2a6   : > { %1983 = vpush %v1691_v26  ;;  %v1704_v27 = vrot.slane %v1703_v25, 1 }
 0x2a8   : > { %v1705_v28 = vadd.f32 %v1704_v27, %v1703_v25 }
 0x2aa   : > { %1985 = vpush %v1705_v28 }
 0x2d7   : > { %s1984_s14 = spop %1983 }
 0x2d8   : > { %v1710_v50 = vstv %s1984_s14 }
 0x2db   : > { %s1986_s24 = spop %1985 }
 0x2dc   : > { %v1711_v31 = vstv %s1986_s24 }
 0x2dd   : > { %v1712_v32 = vsel %vm1709_vm2, %v1710_v50, %v1711_v31 }
 0x2de   : > { %1713 = vst [vmem:[%s285_s23] sm:$0xff] %v1712_v32 }
 0x2df PF: > { %s17_s20 = sadd.s32 1, %s2160_s20   ;;  %s2528_s15 = smov %s2144_s16 }
 0x2e0   : > { %p14_p8 = scmp.ge.s32.totalorder %s17_s20, 4   ;;  %s2529_s16 = smov %s2148_s17 }
 0x2e1   : > { %s2530_s17 = smov %s2241_s27  ;;  %s2531_s18 = smov %s2156_s19 }
 0x2e2   : > { %s2532_s19 = smov %s2534_s22  ;;  %16 = sbr.rel (!%p14_p8) target bundleno = 4 (0x4), region = 97 }
 0x2e7   :  { %1733 = vsyncpa [#allocation6], 1 }
 0x2e8   :  { %1735 = vsyncpa [#allocation6 + $0x1], 1 }

</bundles_post_ra>
